<compile_context>
chip_gen: v5e
topology: v5e:2x2
jax: 0.10.0
libtpu: 0.0.40
codegen_flags: <defaults>
</compile_context>

<pallas_src>
import jax
import jax.numpy as jnp
from jax.experimental import pallas as pl
from jax.experimental.pallas import tpu as pltpu

INPUT_DIM = 256
HIDDEN_DIM = 512
HALF_DIM = HIDDEN_DIM // 2          # 256
HEAD_DIM = 1 + 1 + 10 + 3           # 15 real head outputs
HEAD_PAD = 128                      # heads padded to one lane-width
FUSED_DIM = HALF_DIM + HEAD_PAD     # 384: single lane-dense output slab


def _round_up(x, m):
    return ((x + m - 1) // m) * m


def _difficulty_kernel(x_ref, w1_ref, b1_ref, w2_ref, b2_ref, wh_ref, bh_ref,
                       out_ref):
    x = x_ref[...]                                                   # bf16 (tb, 256)

    # ---- performance_analyzer (eval BatchNorm already folded into w2/b2) ----
    h1 = jnp.dot(x, w1_ref[...], preferred_element_type=jnp.float32)
    h1 = jnp.maximum(h1 + b1_ref[...], 0.0)                          # ReLU, f32
    # Dropout(0.2): identity in eval mode.

    h2 = jnp.dot(h1.astype(jnp.bfloat16), w2_ref[...],
                 preferred_element_type=jnp.float32)
    h2 = jnp.maximum(h2 + b2_ref[...], 0.0)                          # ReLU, f32
    # Dropout(0.1): identity in eval mode.

    # analyzed_features -> first 256 lanes of the fused bf16 output slab.
    out_ref[:, :HALF_DIM] = h2.astype(jnp.bfloat16)

    # ---- fused heads (padded 256 -> 128 matmul; only first 15 cols real) ----
    logits = jnp.dot(h2.astype(jnp.bfloat16), wh_ref[...],
                     preferred_element_type=jnp.float32)
    logits = logits + bh_ref[...]                                    # (tb, 128)

    lane = jax.lax.broadcasted_iota(jnp.int32, logits.shape, 1)

    # sigmoid heads (cols 0, 1)
    sig = jax.nn.sigmoid(logits)

    # challenge-zone softmax over cols 12..14 (masked softmax on padded lanes).
    zone_mask = (lane >= 12) & (lane < 12 + 3)
    zmax = jnp.max(jnp.where(zone_mask, logits, -jnp.inf), axis=-1, keepdims=True)
    # Clamp before exp so non-zone lanes can never overflow, then mask to 0.
    zexp = jnp.where(zone_mask, jnp.exp(jnp.minimum(logits - zmax, 0.0)), 0.0)
    zsum = jnp.sum(zexp, axis=-1, keepdims=True)
    zsoft = zexp / zsum                 # exact reciprocal: probs sum to 1

    heads = jnp.where(lane < 2, sig, jnp.where(zone_mask, zsoft, logits))
    out_ref[:, HALF_DIM:] = heads.astype(jnp.bfloat16)


def make_raw_params(key):
    """Deterministic synthetic parameters, PyTorch-equivalent (unfolded) form."""
    ks = jax.random.split(key, 12)

    def init(k, shape, scale):
        return jax.random.normal(k, shape, dtype=jnp.float32) * scale

    w1 = init(ks[0], (INPUT_DIM, HIDDEN_DIM), 1.0 / jnp.sqrt(INPUT_DIM))
    b1 = init(ks[1], (1, HIDDEN_DIM), 0.02)

    # BatchNorm1d(hidden_dim), eval mode parameters.
    gamma = 1.0 + 0.1 * jax.random.normal(ks[2], (1, HIDDEN_DIM), dtype=jnp.float32)
    beta = 0.05 * jax.random.normal(ks[3], (1, HIDDEN_DIM), dtype=jnp.float32)
    running_mean = 0.1 * jax.random.normal(ks[11], (1, HIDDEN_DIM), dtype=jnp.float32)
    running_var = jnp.ones((1, HIDDEN_DIM), jnp.float32)
    eps = 1e-5

    w2 = init(ks[4], (HIDDEN_DIM, HALF_DIM), 1.0 / jnp.sqrt(HIDDEN_DIM))
    b2 = init(ks[5], (1, HALF_DIM), 0.02)

    w_diff = init(ks[6], (HALF_DIM, 1), 1.0 / jnp.sqrt(HALF_DIM))
    w_conf = init(ks[7], (HALF_DIM, 1), 1.0 / jnp.sqrt(HALF_DIM))
    w_lc = init(ks[8], (HALF_DIM, 10), 1.0 / jnp.sqrt(HALF_DIM))
    w_cz = init(ks[9], (HALF_DIM, 3), 1.0 / jnp.sqrt(HALF_DIM))
    b_heads = init(ks[10], (1, HEAD_DIM), 0.02)

    return dict(w1=w1, b1=b1, gamma=gamma, beta=beta,
                running_mean=running_mean, running_var=running_var, eps=eps,
                w2=w2, b2=b2,
                w_diff=w_diff, w_conf=w_conf, w_lc=w_lc, w_cz=w_cz,
                b_heads=b_heads)


def prepare_kernel_params(raw):
    """Fold eval-mode BatchNorm into Linear2, fuse+pad the heads, cast to bf16."""
    bn_scale = raw["gamma"] / jnp.sqrt(raw["running_var"] + raw["eps"])   # (1, 512)
    bn_shift = raw["beta"] - raw["running_mean"] * bn_scale               # (1, 512)

    # BN(h) @ W2 + b2  ==  h @ (scale.T * W2) + (shift @ W2 + b2)
    w2_folded = raw["w2"] * bn_scale.reshape(-1, 1)                       # (512, 256)
    b2_folded = bn_shift @ raw["w2"] + raw["b2"]                          # (1, 256)

    wh = jnp.concatenate([raw["w_diff"], raw["w_conf"],
                          raw["w_lc"], raw["w_cz"]], axis=1)              # (256, 15)
    wh = jnp.pad(wh, ((0, 0), (0, HEAD_PAD - HEAD_DIM)))                  # (256, 128)
    bh = jnp.pad(raw["b_heads"], ((0, 0), (0, HEAD_PAD - HEAD_DIM)))      # (1, 128)

    return dict(
        w1=raw["w1"].astype(jnp.bfloat16),
        b1=raw["b1"].astype(jnp.float32),
        w2=w2_folded.astype(jnp.bfloat16),
        b2=b2_folded.astype(jnp.float32),
        wh=wh.astype(jnp.bfloat16),
        bh=bh.astype(jnp.float32),
    )


def adaptive_difficulty_forward(x, kparams, *, block_b=512):
    """Outputs are bf16 (kernel is HBM-write bound; cast downstream if needed)."""
    B = x.shape[0]
    assert x.shape == (B, INPUT_DIM)

    # --- batch tiling ---
    # nb grid steps, each tile <= block_b rows.  Force >= 2 steps once the
    # batch is large enough so v7x's second TensorCore gets work (one extra
    # ~0.35us grid step on v5e/v6e is negligible).
    nb = max(1, (B + block_b - 1) // block_b)
    if nb == 1 and B >= 64:
        nb = 2
    # Split padding evenly across tiles; round tile to 16 rows (bf16 sublane
    # pairs) so batches just over a tile boundary don't pay for a dead tile.
    tb = _round_up(max(1, (B + nb - 1) // nb), 16)
    b_pad = nb * tb

    x_bf16 = x.astype(jnp.bfloat16)
    if b_pad != B:
        x_bf16 = jnp.pad(x_bf16, ((0, b_pad - B), (0, 0)))

    tiled = lambda shape: pl.BlockSpec(shape, lambda i: (i, 0))
    resident = lambda shape: pl.BlockSpec(shape, lambda i: (0, 0))  # VMEM-resident

    fused = pl.pallas_call(
        _difficulty_kernel,
        out_shape=jax.ShapeDtypeStruct((b_pad, FUSED_DIM), jnp.bfloat16),
        grid=(nb,),
        in_specs=[
            tiled((tb, INPUT_DIM)),                 # x tile (pipelined)
            resident((INPUT_DIM, HIDDEN_DIM)),      # w1
            resident((1, HIDDEN_DIM)),              # b1
            resident((HIDDEN_DIM, HALF_DIM)),       # w2 (BN folded)
            resident((1, HALF_DIM)),                # b2 (BN folded)
            resident((HALF_DIM, HEAD_PAD)),         # wh (fused heads)
            resident((1, HEAD_PAD)),                # bh
        ],
        out_specs=tiled((tb, FUSED_DIM)),           # single lane-dense bf16 slab
        compiler_params=pltpu.CompilerParams(
            # "parallel" shards the batch axis across TensorCores on v7x.
            dimension_semantics=("parallel",),
            vmem_limit_bytes=32 << 20,              # safe on v5e/v6e/v7x
        ),
    )(x_bf16, kparams["w1"], kparams["b1"], kparams["w2"], kparams["b2"],
      kparams["wh"], kparams["bh"])

    fused = fused[:B]
    feat = fused[:, :HALF_DIM]
    heads = fused[:, HALF_DIM:]
    return {
        "difficulty_score": heads[:, 0:1],
        "confidence_score": heads[:, 1:2],
        "learning_curve_prediction": heads[:, 2:12],
        "challenge_zone_probs": heads[:, 12:15],
        "analyzed_features": feat,
    }


def _reference_forward(x, raw):
    """Pure-JAX f32 reference of the original (eval-mode) forward pass."""
    h1 = jnp.maximum(x @ raw["w1"] + raw["b1"], 0.0)
    bn_scale = raw["gamma"] / jnp.sqrt(raw["running_var"] + raw["eps"])
    bn_shift = raw["beta"] - raw["running_mean"] * bn_scale
    h1 = h1 * bn_scale + bn_shift
    h2 = jnp.maximum(h1 @ raw["w2"] + raw["b2"], 0.0)
    wh = jnp.concatenate([raw["w_diff"], raw["w_conf"],
                          raw["w_lc"], raw["w_cz"]], axis=1)
    logits = h2 @ wh + raw["b_heads"]
    return {
        "difficulty_score": jax.nn.sigmoid(logits[:, 0:1]),
        "confidence_score": jax.nn.sigmoid(logits[:, 1:2]),
        "learning_curve_prediction": logits[:, 2:12],
        "challenge_zone_probs": jax.nn.softmax(logits[:, 12:15], axis=-1),
        "analyzed_features": h2,
    }


if __name__ == "__main__":
    key = jax.random.PRNGKey(0)
    pkey, xkey_a, xkey_b = jax.random.split(key, 3)
    raw_params = make_raw_params(pkey)
    kparams = prepare_kernel_params(raw_params)

    def _check(batch, xk):
        x = jax.random.normal(xk, (batch, INPUT_DIM), dtype=jnp.float32)
        out = adaptive_difficulty_forward(x, kparams)
        out = jax.tree_util.tree_map(jax.block_until_ready, out)
        ref = _reference_forward(x, raw_params)
        # bf16 MXU inputs + bf16 outputs vs f32 reference -> loosened tolerance.
        for name in ref:
            assert out[name].shape == ref[name].shape, name
            assert jnp.allclose(out[name].astype(jnp.float32), ref[name],
                                atol=3e-2, rtol=3e-2), name

    _check(8, xkey_a)     # single-tile path (nb=1, tb=16)
    _check(200, xkey_b)   # multi-tile path (nb=2) with padded rows
    print("KERNEL_OK")
</pallas_src>

<mosaic_0001>
module attributes {stable_mosaic.version = 11 : i64} {
  func.func @_difficulty_kernel(%arg0: i32, %arg1: memref<16x256xbf16, #tpu.memory_space<vmem>>, %arg2: memref<256x512xbf16, #tpu.memory_space<vmem>>, %arg3: memref<1x512xf32, #tpu.memory_space<vmem>>, %arg4: memref<512x256xbf16, #tpu.memory_space<vmem>>, %arg5: memref<1x256xf32, #tpu.memory_space<vmem>>, %arg6: memref<256x128xbf16, #tpu.memory_space<vmem>>, %arg7: memref<1x128xf32, #tpu.memory_space<vmem>>, %arg8: memref<16x384xbf16, #tpu.memory_space<vmem>>) attributes {dimension_semantics = [#tpu.dimension_semantics<parallel>], iteration_bounds = array<i64: 1>, scalar_prefetch = 0 : i64, scratch_operands = 0 : i64, tpu.core_type = #tpu.core_type<tc>, window_params = [{transform_indices = @transform_0, window_bounds = array<i64: 16, 256>}, {pipeline_mode = #tpu.pipeline_mode<synchronous>, transform_indices = @transform_1, window_bounds = array<i64: 256, 512>}, {pipeline_mode = #tpu.pipeline_mode<synchronous>, transform_indices = @transform_2, window_bounds = array<i64: 1, 512>}, {pipeline_mode = #tpu.pipeline_mode<synchronous>, transform_indices = @transform_3, window_bounds = array<i64: 512, 256>}, {pipeline_mode = #tpu.pipeline_mode<synchronous>, transform_indices = @transform_4, window_bounds = array<i64: 1, 256>}, {pipeline_mode = #tpu.pipeline_mode<synchronous>, transform_indices = @transform_5, window_bounds = array<i64: 256, 128>}, {pipeline_mode = #tpu.pipeline_mode<synchronous>, transform_indices = @transform_6, window_bounds = array<i64: 1, 128>}, {transform_indices = @transform_7, window_bounds = array<i64: 16, 384>}]} {
    %c0 = arith.constant 0 : index
    %c0_0 = arith.constant 0 : index
    %0 = vector.load %arg1[%c0, %c0_0] : memref<16x256xbf16, #tpu.memory_space<vmem>>, vector<16x256xbf16>
    %c0_1 = arith.constant 0 : index
    %c0_2 = arith.constant 0 : index
    %1 = vector.load %arg2[%c0_1, %c0_2] : memref<256x512xbf16, #tpu.memory_space<vmem>>, vector<256x512xbf16>
    %cst = arith.constant dense<0.000000e+00> : vector<16x512xf32>
    %2 = tpu.matmul %0, %1, %cst {dimension_numbers = #tpu.dot_dimension_numbers<[1], [0], [0], [1], [0, 0, 1, 1], [], []>} : vector<16x256xbf16>, vector<256x512xbf16>, vector<16x512xf32> -> vector<16x512xf32>
    %c0_3 = arith.constant 0 : index
    %c0_4 = arith.constant 0 : index
    %3 = vector.load %arg3[%c0_3, %c0_4] : memref<1x512xf32, #tpu.memory_space<vmem>>, vector<1x512xf32>
    %4 = vector.broadcast %3 : vector<1x512xf32> to vector<16x512xf32>
    %5 = arith.addf %2, %4 : vector<16x512xf32>
    %cst_5 = arith.constant 0.000000e+00 : f32
    %6 = vector.broadcast %cst_5 : f32 to vector<16x512xf32>
    %7 = arith.maximumf %5, %6 : vector<16x512xf32>
    %8 = arith.truncf %7 : vector<16x512xf32> to vector<16x512xbf16>
    %c0_6 = arith.constant 0 : index
    %c0_7 = arith.constant 0 : index
    %9 = vector.load %arg4[%c0_6, %c0_7] : memref<512x256xbf16, #tpu.memory_space<vmem>>, vector<512x256xbf16>
    %cst_8 = arith.constant dense<0.000000e+00> : vector<16x256xf32>
    %10 = tpu.matmul %8, %9, %cst_8 {dimension_numbers = #tpu.dot_dimension_numbers<[1], [0], [0], [1], [0, 0, 1, 1], [], []>} : vector<16x512xbf16>, vector<512x256xbf16>, vector<16x256xf32> -> vector<16x256xf32>
    %c0_9 = arith.constant 0 : index
    %c0_10 = arith.constant 0 : index
    %11 = vector.load %arg5[%c0_9, %c0_10] : memref<1x256xf32, #tpu.memory_space<vmem>>, vector<1x256xf32>
    %12 = vector.broadcast %11 : vector<1x256xf32> to vector<16x256xf32>
    %13 = arith.addf %10, %12 : vector<16x256xf32>
    %cst_11 = arith.constant 0.000000e+00 : f32
    %14 = vector.broadcast %cst_11 : f32 to vector<16x256xf32>
    %15 = arith.maximumf %13, %14 : vector<16x256xf32>
    %16 = arith.truncf %15 : vector<16x256xf32> to vector<16x256xbf16>
    %c0_12 = arith.constant 0 : index
    %c0_13 = arith.constant 0 : index
    %17 = vector.load %arg8[%c0_12, %c0_13] : memref<16x384xbf16, #tpu.memory_space<vmem>>, vector<16x256xbf16>
    tpu.vector_store %arg8[%c0_12, %c0_13], %16 {strides = array<i32>} : memref<16x384xbf16, #tpu.memory_space<vmem>>, vector<16x256xbf16>,
    %18 = arith.truncf %15 : vector<16x256xf32> to vector<16x256xbf16>
    %c0_14 = arith.constant 0 : index
    %c0_15 = arith.constant 0 : index
    %19 = vector.load %arg6[%c0_14, %c0_15] : memref<256x128xbf16, #tpu.memory_space<vmem>>, vector<256x128xbf16>
    %cst_16 = arith.constant dense<0.000000e+00> : vector<16x128xf32>
    %20 = tpu.matmul %18, %19, %cst_16 {dimension_numbers = #tpu.dot_dimension_numbers<[1], [0], [0], [1], [0, 0, 1, 1], [], []>} : vector<16x256xbf16>, vector<256x128xbf16>, vector<16x128xf32> -> vector<16x128xf32>
    %c0_17 = arith.constant 0 : index
    %c0_18 = arith.constant 0 : index
    %21 = vector.load %arg7[%c0_17, %c0_18] : memref<1x128xf32, #tpu.memory_space<vmem>>, vector<1x128xf32>
    %22 = vector.broadcast %21 : vector<1x128xf32> to vector<16x128xf32>
    %23 = arith.addf %20, %22 : vector<16x128xf32>
    %24 = tpu.iota {dimensions = array<i32: 1>} : vector<16x128xi32>
    %25 = arith.negf %23 : vector<16x128xf32>
    %26 = math.exp %25 : vector<16x128xf32>
    %cst_19 = arith.constant 1.000000e+00 : f32
    %27 = vector.broadcast %cst_19 : f32 to vector<16x128xf32>
    %28 = arith.addf %27, %26 : vector<16x128xf32>
    %29 = arith.divf %27, %28 : vector<16x128xf32>
    %c12_i32 = arith.constant 12 : i32
    %30 = vector.broadcast %c12_i32 : i32 to vector<16x128xi32>
    %31 = arith.cmpi sge, %24, %30 : vector<16x128xi32>
    %c15_i32 = arith.constant 15 : i32
    %32 = vector.broadcast %c15_i32 : i32 to vector<16x128xi32>
    %33 = arith.cmpi slt, %24, %32 : vector<16x128xi32>
    %34 = arith.andi %31, %33 : vector<16x128xi1>
    %cst_20 = arith.constant 0xFF800000 : f32
    %35 = vector.broadcast %cst_20 : f32 to vector<16x128xf32>
    %36 = arith.select %34, %23, %35 : vector<16x128xi1>, vector<16x128xf32>
    %cst_21 = arith.constant dense<0xFF800000> : vector<16xf32>
    %37 = vector.multi_reduction <maximumf>, %36, %cst_21 [1] : vector<16x128xf32> to vector<16xf32>
    %38 = vector.shape_cast %37 : vector<16xf32> to vector<16x1xf32>
    %39 = vector.broadcast %38 : vector<16x1xf32> to vector<16x128xf32>
    %40 = arith.subf %23, %39 : vector<16x128xf32>
    %cst_22 = arith.constant 0.000000e+00 : f32
    %41 = vector.broadcast %cst_22 : f32 to vector<16x128xf32>
    %42 = arith.minimumf %40, %41 : vector<16x128xf32>
    %43 = math.exp %42 : vector<16x128xf32>
    %cst_23 = arith.constant 0.000000e+00 : f32
    %44 = vector.broadcast %cst_23 : f32 to vector<16x128xf32>
    %45 = arith.select %34, %43, %44 : vector<16x128xi1>, vector<16x128xf32>
    %cst_24 = arith.constant dense<0.000000e+00> : vector<16xf32>
    %46 = vector.multi_reduction <add>, %45, %cst_24 [1] : vector<16x128xf32> to vector<16xf32>
    %47 = vector.shape_cast %46 : vector<16xf32> to vector<16x1xf32>
    %48 = vector.broadcast %47 : vector<16x1xf32> to vector<16x128xf32>
    %49 = arith.divf %45, %48 : vector<16x128xf32>
    %c2_i32 = arith.constant 2 : i32
    %50 = vector.broadcast %c2_i32 : i32 to vector<16x128xi32>
    %51 = arith.cmpi slt, %24, %50 : vector<16x128xi32>
    %52 = arith.select %34, %49, %23 : vector<16x128xi1>, vector<16x128xf32>
    %53 = arith.select %51, %29, %52 : vector<16x128xi1>, vector<16x128xf32>
    %54 = arith.truncf %53 : vector<16x128xf32> to vector<16x128xbf16>
    %c0_25 = arith.constant 0 : index
    %c256 = arith.constant 256 : index
    %55 = vector.load %arg8[%c0_25, %c256] : memref<16x384xbf16, #tpu.memory_space<vmem>>, vector<16x128xbf16>
    tpu.vector_store %arg8[%c0_25, %c256], %54 {strides = array<i32>} : memref<16x384xbf16, #tpu.memory_space<vmem>>, vector<16x128xbf16>,
    return
  }
  func.func @transform_0(%arg0: i32) -> (i32, i32) {
    %c0_i32 = arith.constant 0 : i32
    %c0_i32_0 = arith.constant 0 : i32
    return %arg0, %c0_i32 : i32, i32
  }
  func.func @transform_1(%arg0: i32) -> (i32, i32) {
    %c0_i32 = arith.constant 0 : i32
    %c0_i32_0 = arith.constant 0 : i32
    %c0_i32_1 = arith.constant 0 : i32
    return %c0_i32, %c0_i32_0 : i32, i32
  }
  func.func @transform_2(%arg0: i32) -> (i32, i32) {
    %c0_i32 = arith.constant 0 : i32
    %c0_i32_0 = arith.constant 0 : i32
    %c0_i32_1 = arith.constant 0 : i32
    return %c0_i32, %c0_i32_0 : i32, i32
  }
  func.func @transform_3(%arg0: i32) -> (i32, i32) {
    %c0_i32 = arith.constant 0 : i32
    %c0_i32_0 = arith.constant 0 : i32
    %c0_i32_1 = arith.constant 0 : i32
    return %c0_i32, %c0_i32_0 : i32, i32
  }
  func.func @transform_4(%arg0: i32) -> (i32, i32) {
    %c0_i32 = arith.constant 0 : i32
    %c0_i32_0 = arith.constant 0 : i32
    %c0_i32_1 = arith.constant 0 : i32
    return %c0_i32, %c0_i32_0 : i32, i32
  }
  func.func @transform_5(%arg0: i32) -> (i32, i32) {
    %c0_i32 = arith.constant 0 : i32
    %c0_i32_0 = arith.constant 0 : i32
    %c0_i32_1 = arith.constant 0 : i32
    return %c0_i32, %c0_i32_0 : i32, i32
  }
  func.func @transform_6(%arg0: i32) -> (i32, i32) {
    %c0_i32 = arith.constant 0 : i32
    %c0_i32_0 = arith.constant 0 : i32
    %c0_i32_1 = arith.constant 0 : i32
    return %c0_i32, %c0_i32_0 : i32, i32
  }
  func.func @transform_7(%arg0: i32) -> (i32, i32) {
    %c0_i32 = arith.constant 0 : i32
    %c0_i32_0 = arith.constant 0 : i32
    return %arg0, %c0_i32 : i32, i32
  }
}

</mosaic_0001>

<bundles_post_ra>
// kernel: tpu_custom_call.1
= control target key start
LH: loop header
LB: loop body
LE: loop exit
PB: predicated region body
PF: predicated region fallthrough
CT: control target
= control target key end

     0   :  { %12 = vsyncpa [#allocation3], 0  ;;  %s2508_s0 = inlined_call_operand.hbm [shape: bf16[16,256], index: 0, kind: input, shape index: {}]   ;;  %s2509_s1 = inlined_call_operand.hbm [shape: bf16[256,512], index: 1, kind: input, shape index: {}]   ;;  %s2510_s2 = inlined_call_operand.hbm [shape: f32[1,512], index: 2, kind: input, shape index: {}]   ;;  %s2511_s3 = inlined_call_operand.hbm [shape: bf16[512,256], index: 3, kind: input, shape index: {}]   ;;  %s2512_s4 = inlined_call_operand.vmem [shape: f32[1,256], index: 4, kind: input, shape index: {}]   ;;  %s2513_s5 = inlined_call_operand.hbm [shape: bf16[256,128], index: 5, kind: input, shape index: {}]   ;;  %s2514_s6 = inlined_call_operand.vmem [shape: f32[1,128], index: 6, kind: input, shape index: {}]   ;;  %s2515_s7 = inlined_call_operand.hbm [shape: bf16[16,384], index: 7, kind: output, shape index: {}]  }
   0x1   :  { %13 = vsyncpa [#allocation6], 0 }
   0x2   :  { %14 = vsyncpa [#allocation9], 0  ;;  %s33_s26 = sshll.u32 %s2509_s1, 4  ;;  %s34_s26 = int_to_ptr.hbm [resolvable:$true] %s33_s26 }
   0x3   :  { %15 = vsyncpa [#allocation4], 0  ;;  %s2351_s27 = smov [#allocation5]   ;;  %s2352_s29 = smov 256  }
   0x4   :  { %s35_s28 = sshll.u32 %s2351_s27, 4  ;;  %s2353_s30 = smov 16   ;;  %s36_s28 = int_to_ptr.vmem [resolvable:$true] %s35_s28 }
   0x5   :  { %41 = dma.hbm_to_vmem [thread:$0]  %s34_s26, 8192, %s36_s28, [#allocation6], %s2352_s29, %s2352_s29, %s2353_s30  }
   0x6   :  { %s57_s10 = sshll.u32 %s2511_s3, 4  ;;  %s2354_s11 = smov [#allocation8]   ;;  %s58_s10 = int_to_ptr.hbm [resolvable:$true] %s57_s10 }
   0x7   :  { %s59_s12 = sshll.u32 %s2354_s11, 4  ;;  %s20_s15 = sshll.u32 %s2508_s0, 4  ;;  %s60_s12 = int_to_ptr.vmem [resolvable:$true] %s59_s12  ;;  %s21_s15 = int_to_ptr.hbm [resolvable:$true] %s20_s15 }
   0x8   :  { %s2355_s1 = smov 128   ;;  %s2356_s16 = smov 8  }
   0x9   :  { %65 = dma.hbm_to_vmem [thread:$0]  %s58_s10, 8192, %s60_s12, [#allocation9], %s2355_s1, %s2355_s1, %s2356_s16  }
   0xa   :  { %s47_s19 = sshll.u32 %s2510_s2, 4  ;;  %s2357_s20 = smov [#allocation2]   ;;  %s48_s19 = int_to_ptr.hbm [resolvable:$true] %s47_s19 }
   0xb   :  { %s22_s21 = sshll.u32 %s2357_s20, 4  ;;  %s2358_s3 = smov [#allocation7]   ;;  %s23_s21 = int_to_ptr.vmem [resolvable:$true] %s22_s21 }
   0xc   :  { %28 = dma.hbm_to_vmem [thread:$0]  %s21_s15, 256, %s23_s21, [#allocation3], %s2355_s1, %s2355_s1, %s2356_s16  }
   0xd   :  { %s49_s22 = sshll.u32 %s2358_s3, 4  ;;  %s72_s0 = sshll.u32 %s2513_s5, 4  ;;  %s50_s22 = int_to_ptr.vmem [resolvable:$true] %s49_s22  ;;  %s73_s0 = int_to_ptr.hbm [resolvable:$true] %s72_s0 }
   0xe   :  { %52 = dma.hbm_to_vmem [thread:$0]  %s48_s19, 64, %s50_s22, [#allocation6]  }
   0xf   :  { %s2359_s25 = smov [#allocation10]   ;;  %s2360_s27 = smov 64  }
  0x10   :  { %s74_s26 = sshll.u32 %s2359_s25, 4  ;;  %s2361_s28 = smov 4   ;;  %s75_s26 = int_to_ptr.vmem [resolvable:$true] %s74_s26 }
  0x11   :  { %80 = dma.hbm_to_vmem [thread:$0]  %s73_s0, 2048, %s75_s26, [#allocation9], %s2360_s27, %s2360_s27, %s2361_s28  }
  0x12   :  { %2343 = dma.done.wait [#allocation3], 256  }
  0x13   :  { %2344 = vsyncadd [#allocation3], 4294967040 }
  0x14   :  { %2345 = dma.done.wait [#allocation6], 8256  }
  0x15   :  { %2346 = vsyncadd [#allocation6], 4294959040 }
  0x16   :  { %2347 = dma.done.wait [#allocation9], 10240  }
  0x17   :  { %2348 = vsyncadd [#allocation9], 4294957056  ;;  %v1558_v0 = vld [vmem:[#allocation5 + $0xe0] sm:$0xf]  ;;  %v2054_v1 = vld [vmem:[#allocation5 + $0xec] sm:$0xf0] }
  0x18   :  { %v1686_v2 = vld [vmem:[#allocation5 + $0x1e0] sm:$0xf]  ;;  %v1559_v3 = vor.u32 %v2054_v1, %v1558_v0  ;;  %v2086_v4 = vld [vmem:[#allocation5 + $0x1ec] sm:$0xf0]  ;;  %v2052_v5 = vld [vmem:[#allocation5 + $0xe4] sm:$0xf] }
  0x19   :  { %v1560_v6 = vld [vmem:[#allocation5 + $0xf0] sm:$0xf0]  ;;  %v1687_v7 = vor.u32 %v2086_v4, %v1686_v2  ;;  %v2084_v9 = vld [vmem:[#allocation5 + $0x1e4] sm:$0xf]  ;;  %v1542_v11 = vld [vmem:[#allocation5 + $0xc0] sm:$0xf] }
  0x1a   :  { %v1563_v8 = vor.u32 %v2052_v5, %v1560_v6  ;;  %v1688_v10 = vld [vmem:[#allocation5 + $0x1f0] sm:$0xf0]  ;;  %509 = vmatpush.bf16.msra.mxu0 %v1559_v3  ;;  %v2050_v13 = vld [vmem:[#allocation5 + $0xcc] sm:$0xf0]  ;;  %v1670_v14 = vld [vmem:[#allocation5 + $0x1c0] sm:$0xf] }
  0x1b   :  { %v1691_v12 = vor.u32 %v2084_v9, %v1688_v10  ;;  %v2082_v15 = vld [vmem:[#allocation5 + $0x1cc] sm:$0xf0]  ;;  %523 = vmatpush.bf16.msra.mxu1 %v1687_v7  ;;  %v1543_v16 = vor.u32 %v2050_v13, %v1542_v11  ;;  %v2048_v18 = vld [vmem:[#allocation5 + $0xc4] sm:$0xf]  ;;  %v1544_v19 = vld [vmem:[#allocation5 + $0xd0] sm:$0xf0] }
  0x1c   :  { %537 = vmatpush.bf16.msra.mxu2 %v1563_v8  ;;  %v1671_v17 = vor.u32 %v2082_v15, %v1670_v14  ;;  %v2080_v20 = vld [vmem:[#allocation5 + $0x1c4] sm:$0xf]  ;;  %v1547_v21 = vor.u32 %v2048_v18, %v1544_v19  ;;  %v1672_v22 = vld [vmem:[#allocation5 + $0x1d0] sm:$0xf0]  ;;  %v1526_v23 = vld [vmem:[#allocation5 + $0xa0] sm:$0xf] }
  0x1d   :  { %551 = vmatpush.bf16.msra.mxu3 %v1691_v12  ;;  %v2046_v24 = vld [vmem:[#allocation5 + $0xac] sm:$0xf0]  ;;  %v1675_v25 = vor.u32 %v2080_v20, %v1672_v22  ;;  %v1654_v26 = vld [vmem:[#allocation5 + $0x1a0] sm:$0xf]  ;;  %v2044_v28 = vld [vmem:[#allocation5 + $0xa4] sm:$0xf] }
  0x1e   :  { %v2078_v27 = vld [vmem:[#allocation5 + $0x1ac] sm:$0xf0]  ;;  %510 = vmatpush.bf16.msra.mxu0 %v1543_v16  ;;  %v1527_v29 = vor.u32 %v2046_v24, %v1526_v23  ;;  %v1528_v30 = vld [vmem:[#allocation5 + $0xb0] sm:$0xf0]  ;;  %v2076_v31 = vld [vmem:[#allocation5 + $0x1a4] sm:$0xf] }
  0x1f   :  { %v1656_v32 = vld [vmem:[#allocation5 + $0x1b0] sm:$0xf0]  ;;  %524 = vmatpush.bf16.msra.mxu1 %v1671_v17  ;;  %v1655_v33 = vor.u32 %v2078_v27, %v1654_v26  ;;  %v1531_v34 = vor.u32 %v2044_v28, %v1528_v30  ;;  %v1510_v35 = vld [vmem:[#allocation5 + $0x80] sm:$0xf]  ;;  %v2042_v36 = vld [vmem:[#allocation5 + $0x8c] sm:$0xf0] }
  0x20   :  { %538 = vmatpush.bf16.msra.mxu2 %v1547_v21  ;;  %v1638_v37 = vld [vmem:[#allocation5 + $0x180] sm:$0xf]  ;;  %v1659_v38 = vor.u32 %v2076_v31, %v1656_v32  ;;  %v2074_v39 = vld [vmem:[#allocation5 + $0x18c] sm:$0xf0]  ;;  %v2040_v40 = vld [vmem:[#allocation5 + $0x84] sm:$0xf]  ;;  %v1511_v44 = vor.u32 %v2042_v36, %v1510_v35 }
  0x21   :  { %552 = vmatpush.bf16.msra.mxu3 %v1675_v25  ;;  %v1512_v41 = vld [vmem:[#allocation5 + $0x90] sm:$0xf0]  ;;  %v2072_v42 = vld [vmem:[#allocation5 + $0x184] sm:$0xf]  ;;  %v1639_v45 = vor.u32 %v2074_v39, %v1638_v37  ;;  %v1494_v47 = vld [vmem:[#allocation5 + $0x60] sm:$0xf] }
  0x22   :  { %v1640_v43 = vld [vmem:[#allocation5 + $0x190] sm:$0xf0]  ;;  %511 = vmatpush.bf16.msra.mxu0 %v1527_v29  ;;  %v1515_v46 = vor.u32 %v2040_v40, %v1512_v41  ;;  %v2038_v48 = vld [vmem:[#allocation5 + $0x6c] sm:$0xf0]  ;;  %v1622_v49 = vld [vmem:[#allocation5 + $0x160] sm:$0xf] }
  0x23   :  { %525 = vmatpush.bf16.msra.mxu1 %v1655_v33  ;;  %v1643_v50 = vor.u32 %v2072_v42, %v1640_v43  ;;  %v2070_v51 = vld [vmem:[#allocation5 + $0x16c] sm:$0xf0]  ;;  %v2036_v52 = vld [vmem:[#allocation5 + $0x64] sm:$0xf]  ;;  %v1496_v53 = vld [vmem:[#allocation5 + $0x70] sm:$0xf0]  ;;  %v1495_v56 = vor.u32 %v2038_v48, %v1494_v47 }
  0x24   :  { %539 = vmatpush.bf16.msra.mxu2 %v1531_v34  ;;  %v2068_v54 = vld [vmem:[#allocation5 + $0x164] sm:$0xf]  ;;  %v1624_v55 = vld [vmem:[#allocation5 + $0x170] sm:$0xf0]  ;;  %v1623_v57 = vor.u32 %v2070_v51, %v1622_v49  ;;  %v1499_v58 = vor.u32 %v2036_v52, %v1496_v53  ;;  %v1478_v59 = vld [vmem:[#allocation5 + $0x40] sm:$0xf] }
  0x25   :  { %553 = vmatpush.bf16.msra.mxu3 %v1659_v38  ;;  %v2034_v60 = vld [vmem:[#allocation5 + $0x4c] sm:$0xf0]  ;;  %v1606_v61 = vld [vmem:[#allocation5 + $0x140] sm:$0xf]  ;;  %v1627_v62 = vor.u32 %v2068_v54, %v1624_v55  ;;  %v2032_v0 = vld [vmem:[#allocation5 + $0x44] sm:$0xf] }
  0x26   :  { %512 = vmatpush.bf16.msra.mxu0 %v1511_v44  ;;  %v2066_v63 = vld [vmem:[#allocation5 + $0x14c] sm:$0xf0]  ;;  %v1480_v1 = vld [vmem:[#allocation5 + $0x50] sm:$0xf0]  ;;  %v2064_v2 = vld [vmem:[#allocation5 + $0x144] sm:$0xf]  ;;  %v1479_v4 = vor.u32 %v2034_v60, %v1478_v59 }
  0x27   :  { %526 = vmatpush.bf16.msra.mxu1 %v1639_v45  ;;  %v1608_v3 = vld [vmem:[#allocation5 + $0x150] sm:$0xf0]  ;;  %v1607_v5 = vor.u32 %v2066_v63, %v1606_v61  ;;  %v1483_v6 = vor.u32 %v2032_v0, %v1480_v1  ;;  %v1462_v7 = vld [vmem:[#allocation5 + $0x20] sm:$0xf]  ;;  %v2030_v8 = vld [vmem:[#allocation5 + $0x2c] sm:$0xf0] }
  0x28   :  { %540 = vmatpush.bf16.msra.mxu2 %v1515_v46  ;;  %v1590_v9 = vld [vmem:[#allocation5 + $0x120] sm:$0xf]  ;;  %v1611_v10 = vor.u32 %v2064_v2, %v1608_v3  ;;  %v2062_v11 = vld [vmem:[#allocation5 + $0x12c] sm:$0xf0]  ;;  %v2028_v12 = vld [vmem:[#allocation5 + $0x24] sm:$0xf]  ;;  %v1463_v16 = vor.u32 %v2030_v8, %v1462_v7 }
  0x29   :  { %554 = vmatpush.bf16.msra.mxu3 %v1643_v50  ;;  %v1464_v13 = vld [vmem:[#allocation5 + $0x30] sm:$0xf0]  ;;  %v2060_v14 = vld [vmem:[#allocation5 + $0x124] sm:$0xf]  ;;  %v1446_v17 = vld [vmem:[#allocation5] sm:$0xf]  ;;  %v1591_v20 = vor.u32 %v2062_v11, %v1590_v9 }
  0x2a   :  { %513 = vmatpush.bf16.msra.mxu0 %v1495_v56  ;;  %v1592_v15 = vld [vmem:[#allocation5 + $0x130] sm:$0xf0]  ;;  %v2026_v18 = vld [vmem:[#allocation5 + $0xc] sm:$0xf0]  ;;  %v1574_v19 = vld [vmem:[#allocation5 + $0x100] sm:$0xf]  ;;  %v1467_v21 = vor.u32 %v2028_v12, %v1464_v13 }
  0x2b   :  { %527 = vmatpush.bf16.msra.mxu1 %v1623_v57  ;;  %v2058_v22 = vld [vmem:[#allocation5 + $0x10c] sm:$0xf0]  ;;  %v2024_v23 = vld [vmem:[#allocation5 + $0x4] sm:$0xf]  ;;  %v1448_v24 = vld [vmem:[#allocation5 + $0x10] sm:$0xf0]  ;;  %v1595_v25 = vor.u32 %v2060_v14, %v1592_v15  ;;  %v1447_v32 = vor.u32 %v2026_v18, %v1446_v17 }
  0x2c   :  { %541 = vmatpush.bf16.msra.mxu2 %v1499_v58  ;;  %v2056_v26 = vld [vmem:[#allocation5 + $0x104] sm:$0xf]  ;;  %v1576_v27 = vld [vmem:[#allocation5 + $0x110] sm:$0xf0]  ;;  %v1566_v28 = vld [vmem:[#allocation5 + $0xe8] sm:$0xf]  ;;  %v1575_v36 = vor.u32 %v2058_v22, %v1574_v19  ;;  %v1451_v37 = vor.u32 %v2024_v23, %v1448_v24 }
  0x2d   :  { %555 = vmatpush.bf16.msra.mxu3 %v1627_v62  ;;  %v2055_v29 = vld [vmem:[#allocation5 + $0xf4] sm:$0xf0]  ;;  %v1694_v30 = vld [vmem:[#allocation5 + $0x1e8] sm:$0xf]  ;;  %v2053_v33 = vld [vmem:[#allocation5 + $0xec] sm:$0xf]  ;;  %v1579_v41 = vor.u32 %v2056_v26, %v1576_v27 }
  0x2e   :  { %514 = vmatpush.bf16.msra.mxu0 %v1479_v4  ;;  %v2087_v31 = vld [vmem:[#allocation5 + $0x1f4] sm:$0xf0]  ;;  %v1568_v34 = vld [vmem:[#allocation5 + $0xf8] sm:$0xf0]  ;;  %v2085_v35 = vld [vmem:[#allocation5 + $0x1ec] sm:$0xf]  ;;  %v1567_v42 = vor.u32 %v2055_v29, %v1566_v28 }
  0x2f   :  { %528 = vmatpush.bf16.msra.mxu1 %v1607_v5  ;;  %v1696_v38 = vld [vmem:[#allocation5 + $0x1f8] sm:$0xf0]  ;;  %v1438_v39 = vld [vmem:[#allocation2] sm:$0xf]  ;;  %v2023_v40 = vld [vmem:[#allocation2 + $0x4] sm:$0xf0]  ;;  %v1695_v45 = vor.u32 %v2087_v31, %v1694_v30  ;;  %v1571_v46 = vor.u32 %v2053_v33, %v1568_v34 }
  0x30   :  { %542 = vmatpush.bf16.msra.mxu2 %v1483_v6  ;;  %v2022_v43 = vld [vmem:[#allocation2 + $0x4] sm:$0xf]  ;;  %v1440_v44 = vld [vmem:[#allocation2 + $0x8] sm:$0xf0]  ;;  %v1550_v47 = vld [vmem:[#allocation5 + $0xc8] sm:$0xf]  ;;  %v1699_v50 = vor.u32 %v2085_v35, %v1696_v38  ;;  %v2420_v51 = vor.u32 %v2023_v40, %v1438_v39 }
  0x31   :  { %556 = vmatpush.bf16.msra.mxu3 %v1611_v10  ;;  %v2051_v48 = vld [vmem:[#allocation5 + $0xd4] sm:$0xf0]  ;;  %v1678_v49 = vld [vmem:[#allocation5 + $0x1c8] sm:$0xf]  ;;  %v2049_v53 = vld [vmem:[#allocation5 + $0xcc] sm:$0xf]  ;;  %v2422_v55 = vor.u32 %v2022_v43, %v1440_v44 }
  0x32   :  { %515 = vmatpush.bf16.msra.mxu0 %v1463_v16  ;;  %v2083_v52 = vld [vmem:[#allocation5 + $0x1d4] sm:$0xf0]  ;;  %v1552_v54 = vld [vmem:[#allocation5 + $0xd8] sm:$0xf0]  ;;  %v2081_v56 = vld [vmem:[#allocation5 + $0x1cc] sm:$0xf]  ;;  %v1551_v58 = vor.u32 %v2051_v48, %v1550_v47 }
  0x33   :  { %529 = vmatpush.bf16.msra.mxu1 %v1591_v20  ;;  %v1680_v57 = vld [vmem:[#allocation5 + $0x1d8] sm:$0xf0]  ;;  %v1679_v59 = vor.u32 %v2083_v52, %v1678_v49  ;;  %v1555_v60 = vor.u32 %v2049_v53, %v1552_v54  ;;  %v1534_v61 = vld [vmem:[#allocation5 + $0xa8] sm:$0xf]  ;;  %v2047_v62 = vld [vmem:[#allocation5 + $0xb4] sm:$0xf0] }
  0x34   :  { %543 = vmatpush.bf16.msra.mxu2 %v1467_v21  ;;  %v1662_v63 = vld [vmem:[#allocation5 + $0x1a8] sm:$0xf]  ;;  %v1683_v0 = vor.u32 %v2081_v56, %v1680_v57  ;;  %v2079_v1 = vld [vmem:[#allocation5 + $0x1b4] sm:$0xf0]  ;;  %v2045_v2 = vld [vmem:[#allocation5 + $0xac] sm:$0xf]  ;;  %v1535_v6 = vor.u32 %v2047_v62, %v1534_v61 }
  0x35   :  { %557 = vmatpush.bf16.msra.mxu3 %v1595_v25  ;;  %v1536_v3 = vld [vmem:[#allocation5 + $0xb8] sm:$0xf0]  ;;  %v2077_v4 = vld [vmem:[#allocation5 + $0x1ac] sm:$0xf]  ;;  %v1663_v7 = vor.u32 %v2079_v1, %v1662_v63  ;;  %v1518_v9 = vld [vmem:[#allocation5 + $0x88] sm:$0xf] }
  0x36   :  { %516 = vmatpush.bf16.msra.mxu0 %v1447_v32  ;;  %v1664_v5 = vld [vmem:[#allocation5 + $0x1b8] sm:$0xf0]  ;;  %v1539_v8 = vor.u32 %v2045_v2, %v1536_v3  ;;  %v2043_v10 = vld [vmem:[#allocation5 + $0x94] sm:$0xf0]  ;;  %v1646_v11 = vld [vmem:[#allocation5 + $0x188] sm:$0xf] }
  0x37   :  { %530 = vmatpush.bf16.msra.mxu1 %v1575_v36  ;;  %v1667_v12 = vor.u32 %v2077_v4, %v1664_v5  ;;  %v2075_v13 = vld [vmem:[#allocation5 + $0x194] sm:$0xf0]  ;;  %v2041_v14 = vld [vmem:[#allocation5 + $0x8c] sm:$0xf]  ;;  %v1520_v15 = vld [vmem:[#allocation5 + $0x98] sm:$0xf0]  ;;  %v1519_v18 = vor.u32 %v2043_v10, %v1518_v9 }
  0x38   :  { %544 = vmatpush.bf16.msra.mxu2 %v1451_v37  ;;  %v2073_v16 = vld [vmem:[#allocation5 + $0x18c] sm:$0xf]  ;;  %v1648_v17 = vld [vmem:[#allocation5 + $0x198] sm:$0xf0]  ;;  %v1647_v19 = vor.u32 %v2075_v13, %v1646_v11  ;;  %v1523_v20 = vor.u32 %v2041_v14, %v1520_v15  ;;  %v1502_v21 = vld [vmem:[#allocation5 + $0x68] sm:$0xf] }
  0x39   :  { %558 = vmatpush.bf16.msra.mxu3 %v1579_v41  ;;  %517 = vmatmul.bf16.vlgmr.msra.gmra.mxu0 %v2420_v51  ;;  %v2039_v22 = vld [vmem:[#allocation5 + $0x74] sm:$0xf0]  ;;  %v1630_v23 = vld [vmem:[#allocation5 + $0x168] sm:$0xf]  ;;  %v1651_v24 = vor.u32 %v2073_v16, %v1648_v17  ;;  %v2037_v26 = vld [vmem:[#allocation5 + $0x6c] sm:$0xf] }
  0x3a   :  { %565 = vmatpush.bf16.msrb.mxu0 %v1567_v42  ;;  %531 = vmatmul.bf16.vlgmr.msra.gmra.mxu1 %v2422_v55  ;;  %v2071_v25 = vld [vmem:[#allocation5 + $0x174] sm:$0xf0]  ;;  %v1504_v27 = vld [vmem:[#allocation5 + $0x78] sm:$0xf0]  ;;  %v2069_v28 = vld [vmem:[#allocation5 + $0x16c] sm:$0xf]  ;;  %v1503_v30 = vor.u32 %v2039_v22, %v1502_v21 }
  0x3b   :  { %579 = vmatpush.bf16.msrb.mxu1 %v1695_v45  ;;  %545 = vmatmul.bf16.vlgmr.msra.gmra.mxu2 %v2420_v51  ;;  %v1632_v29 = vld [vmem:[#allocation5 + $0x178] sm:$0xf0]  ;;  %v1631_v31 = vor.u32 %v2071_v25, %v1630_v23  ;;  %v1507_v32 = vor.u32 %v2037_v26, %v1504_v27  ;;  %v1486_v33 = vld [vmem:[#allocation5 + $0x48] sm:$0xf]  ;;  %v2035_v34 = vld [vmem:[#allocation5 + $0x54] sm:$0xf0] }
  0x3c   :  { %593 = vmatpush.bf16.msrb.mxu2 %v1571_v46  ;;  %559 = vmatmul.bf16.vlgmr.msra.gmra.mxu3 %v2422_v55  ;;  %v1614_v35 = vld [vmem:[#allocation5 + $0x148] sm:$0xf]  ;;  %v1635_v36 = vor.u32 %v2069_v28, %v1632_v29  ;;  %v2067_v37 = vld [vmem:[#allocation5 + $0x154] sm:$0xf0]  ;;  %v2033_v38 = vld [vmem:[#allocation5 + $0x4c] sm:$0xf]  ;;  %v1487_v42 = vor.u32 %v2035_v34, %v1486_v33 }
  0x3d   :  { %607 = vmatpush.bf16.msrb.mxu3 %v1699_v50  ;;  %v1488_v39 = vld [vmem:[#allocation5 + $0x58] sm:$0xf0]  ;;  %v2065_v40 = vld [vmem:[#allocation5 + $0x14c] sm:$0xf]  ;;  %v1470_v43 = vld [vmem:[#allocation5 + $0x28] sm:$0xf]  ;;  %v1615_v44 = vor.u32 %v2067_v37, %v1614_v35 }
  0x3e   :  { %566 = vmatpush.bf16.msrb.mxu0 %v1551_v58  ;;  %v1616_v41 = vld [vmem:[#allocation5 + $0x158] sm:$0xf0]  ;;  %v1491_v45 = vor.u32 %v2033_v38, %v1488_v39  ;;  %v2031_v46 = vld [vmem:[#allocation5 + $0x34] sm:$0xf0]  ;;  %v1598_v47 = vld [vmem:[#allocation5 + $0x128] sm:$0xf] }
  0x3f   :  { %580 = vmatpush.bf16.msrb.mxu1 %v1679_v59  ;;  %v1619_v48 = vor.u32 %v2065_v40, %v1616_v41  ;;  %v2063_v49 = vld [vmem:[#allocation5 + $0x134] sm:$0xf0]  ;;  %v2029_v50 = vld [vmem:[#allocation5 + $0x2c] sm:$0xf]  ;;  %v1472_v52 = vld [vmem:[#allocation5 + $0x38] sm:$0xf0]  ;;  %v1471_v56 = vor.u32 %v2031_v46, %v1470_v43 }
  0x40   :  { %594 = vmatpush.bf16.msrb.mxu2 %v1555_v60  ;;  %v2061_v53 = vld [vmem:[#allocation5 + $0x12c] sm:$0xf]  ;;  %v1600_v54 = vld [vmem:[#allocation5 + $0x138] sm:$0xf0]  ;;  %v1454_v57 = vld [vmem:[#allocation5 + $0x8] sm:$0xf]  ;;  %v1599_v58 = vor.u32 %v2063_v49, %v1598_v47  ;;  %v1475_v59 = vor.u32 %v2029_v50, %v1472_v52 }
  0x41   :  { %608 = vmatpush.bf16.msrb.mxu3 %v1683_v0  ;;  %v2027_v60 = vld [vmem:[#allocation5 + $0x14] sm:$0xf0]  ;;  %v1582_v61 = vld [vmem:[#allocation5 + $0x108] sm:$0xf]  ;;  %v1603_v63 = vor.u32 %v2061_v53, %v1600_v54  ;;  %v2025_v0 = vld [vmem:[#allocation5 + $0xc] sm:$0xf] }
  0x42   :  { %567 = vmatpush.bf16.msrb.mxu0 %v1535_v6  ;;  %v2059_v62 = vld [vmem:[#allocation5 + $0x114] sm:$0xf0]  ;;  %v1456_v1 = vld [vmem:[#allocation5 + $0x18] sm:$0xf0]  ;;  %v2057_v2 = vld [vmem:[#allocation5 + $0x10c] sm:$0xf]  ;;  %v1455_v6 = vor.u32 %v2027_v60, %v1454_v57 }
  0x43   :  { %581 = vmatpush.bf16.msrb.mxu1 %v1663_v7  ;;  %v1584_v3 = vld [vmem:[#allocation5 + $0x118] sm:$0xf0]  ;;  %v1758_v4 = vld [vmem:[#allocation8 + $0x70] sm:$0xf]  ;;  %v1583_v9 = vor.u32 %v2059_v62, %v1582_v61  ;;  %v1459_v10 = vor.u32 %v2025_v0, %v1456_v1  ;;  %v1750_v13 = vld [vmem:[#allocation8 + $0x60] sm:$0xf] }
  0x44   :  { %595 = vmatpush.bf16.msrb.mxu2 %v1539_v8  ;;  %v2103_v5 = vld [vmem:[#allocation8 + $0x74] sm:$0xf0]  ;;  %v1822_v7 = vld [vmem:[#allocation8 + $0xf0] sm:$0xf]  ;;  %v1587_v11 = vor.u32 %v2057_v2, %v1584_v3  ;;  %v2101_v14 = vld [vmem:[#allocation8 + $0x64] sm:$0xf0] }
  0x45   :  { %609 = vmatpush.bf16.msrb.mxu3 %v1667_v12  ;;  %v2119_v8 = vld [vmem:[#allocation8 + $0xf4] sm:$0xf0]  ;;  %v1759_v12 = vor.u32 %v2103_v5, %v1758_v4  ;;  %v1814_v16 = vld [vmem:[#allocation8 + $0xe0] sm:$0xf]  ;;  %v2117_v17 = vld [vmem:[#allocation8 + $0xe4] sm:$0xf0] }
  0x46   :  { %568 = vmatpush.bf16.msrb.mxu0 %v1519_v18  ;;  %v1823_v15 = vor.u32 %v2119_v8, %v1822_v7  ;;  %v1751_v18 = vor.u32 %v2101_v14, %v1750_v13  ;;  %v1815_v21 = vor.u32 %v2117_v17, %v1814_v16  ;;  %v1806_v22 = vld [vmem:[#allocation8 + $0xd0] sm:$0xf]  ;;  %v2115_v23 = vld [vmem:[#allocation8 + $0xd4] sm:$0xf0]  ;;  %v1734_v25 = vld [vmem:[#allocation8 + $0x40] sm:$0xf] }
  0x47   :  { %582 = vmatpush.bf16.msrb.mxu1 %v1647_v19  ;;  %v1742_v19 = vld [vmem:[#allocation8 + $0x50] sm:$0xf]  ;;  %v2097_v26 = vld [vmem:[#allocation8 + $0x44] sm:$0xf0]  ;;  %v1807_v27 = vor.u32 %v2115_v23, %v1806_v22  ;;  %v1798_v28 = vld [vmem:[#allocation8 + $0xc0] sm:$0xf] }
  0x48   :  { %596 = vmatpush.bf16.msrb.mxu2 %v1523_v20  ;;  %v2099_v20 = vld [vmem:[#allocation8 + $0x54] sm:$0xf0]  ;;  %v2113_v29 = vld [vmem:[#allocation8 + $0xc4] sm:$0xf0]  ;;  %v1790_v34 = vld [vmem:[#allocation8 + $0xb0] sm:$0xf] }
  0x49   :  { %610 = vmatpush.bf16.msrb.mxu3 %v1651_v24  ;;  %v1743_v24 = vor.u32 %v2099_v20, %v1742_v19  ;;  %v1799_v33 = vor.u32 %v2113_v29, %v1798_v28  ;;  %v1782_v38 = vld [vmem:[#allocation8 + $0xa0] sm:$0xf]  ;;  %v2109_v39 = vld [vmem:[#allocation8 + $0xa4] sm:$0xf0]  ;;  %v1710_v41 = vld [vmem:[#allocation8 + $0x10] sm:$0xf] }
  0x4a   :  { %569 = vmatpush.bf16.msrb.mxu0 %v1503_v30  ;;  %v1735_v30 = vor.u32 %v2097_v26, %v1734_v25  ;;  %v1783_v43 = vor.u32 %v2109_v39, %v1782_v38  ;;  %v2089_v46 = vld [vmem:[#allocation8 + $0x4] sm:$0xf0]  ;;  %v2135_v49 = vld [vmem:[#allocation8 + $0x174] sm:$0xf0]  ;;  %v2102_v50 = vld [vmem:[#allocation8 + $0x74] sm:$0xf] }
  0x4b   :  { %583 = vmatpush.bf16.msrb.mxu1 %v1631_v31  ;;  %v1726_v31 = vld [vmem:[#allocation8 + $0x30] sm:$0xf]  ;;  %v1760_v53 = vld [vmem:[#allocation8 + $0x78] sm:$0xf0]  ;;  %v2133_v60 = vld [vmem:[#allocation8 + $0x164] sm:$0xf0] }
  0x4c   :  { %597 = vmatpush.bf16.msrb.mxu2 %v1507_v32  ;;  %v2095_v32 = vld [vmem:[#allocation8 + $0x34] sm:$0xf0]  ;;  %v1774_v54 = vld [vmem:[#allocation8 + $0x90] sm:$0xf]  ;;  %v1763_v57 = vor.u32 %v2102_v50, %v1760_v53  ;;  %v2100_v62 = vld [vmem:[#allocation8 + $0x64] sm:$0xf] }
  0x4d   :  { %611 = vmatpush.bf16.msrb.mxu3 %v1635_v36  ;;  %v1727_v35 = vor.u32 %v2095_v32, %v1726_v31  ;;  %v2093_v36 = vld [vmem:[#allocation8 + $0x24] sm:$0xf0]  ;;  %v1766_v0 = vld [vmem:[#allocation8 + $0x80] sm:$0xf]  ;;  %v1950_v3 = vld [vmem:[#allocation8 + $0x1f0] sm:$0xf] }
  0x4e   :  { %570 = vmatpush.bf16.msrb.mxu0 %v1487_v42  ;;  %v2091_v42 = vld [vmem:[#allocation8 + $0x14] sm:$0xf0]  ;;  %v2105_v2 = vld [vmem:[#allocation8 + $0x84] sm:$0xf0]  ;;  %v2118_v7 = vld [vmem:[#allocation8 + $0xf4] sm:$0xf] }
  0x4f   :  { %584 = vmatpush.bf16.msrb.mxu1 %v1615_v44  ;;  %v1711_v44 = vor.u32 %v2091_v42, %v1710_v41  ;;  %v2151_v4 = vld [vmem:[#allocation8 + $0x1f4] sm:$0xf0]  ;;  %v1767_v5 = vor.u32 %v2105_v2, %v1766_v0  ;;  %v1824_v8 = vld [vmem:[#allocation8 + $0xf8] sm:$0xf0]  ;;  %v1942_v16 = vld [vmem:[#allocation8 + $0x1e0] sm:$0xf] }
  0x50   :  { %598 = vmatpush.bf16.msrb.mxu2 %v1491_v45  ;;  %v1702_v45 = vld [vmem:[#allocation8] sm:$0xf]  ;;  %v1744_v14 = vld [vmem:[#allocation8 + $0x58] sm:$0xf0]  ;;  %v2149_v17 = vld [vmem:[#allocation8 + $0x1e4] sm:$0xf0] }
  0x51   :  { %612 = vmatpush.bf16.msrb.mxu3 %v1619_v48  ;;  %v1703_v47 = vor.u32 %v2089_v46, %v1702_v45  ;;  %v1886_v48 = vld [vmem:[#allocation8 + $0x170] sm:$0xf]  ;;  %v1943_v19 = vor.u32 %v2149_v17, %v1942_v16  ;;  %v1816_v20 = vld [vmem:[#allocation8 + $0xe8] sm:$0xf0]  ;;  %v1862_v22 = vld [vmem:[#allocation8 + $0x140] sm:$0xf] }
  0x52   :  { %571 = vmatpush.bf16.msrb.mxu0 %v1471_v56  ;;  %v1887_v52 = vor.u32 %v2135_v49, %v1886_v48  ;;  %v2107_v56 = vld [vmem:[#allocation8 + $0x94] sm:$0xf0]  ;;  %v2129_v23 = vld [vmem:[#allocation8 + $0x144] sm:$0xf0]  ;;  %v1736_v26 = vld [vmem:[#allocation8 + $0x48] sm:$0xf0] }
  0x53   :  { %585 = vmatpush.bf16.msrb.mxu1 %v1599_v58  ;;  %v1775_v58 = vor.u32 %v2107_v56, %v1774_v54  ;;  %v1863_v25 = vor.u32 %v2129_v23, %v1862_v22  ;;  %v1934_v28 = vld [vmem:[#allocation8 + $0x1d0] sm:$0xf]  ;;  %v2147_v29 = vld [vmem:[#allocation8 + $0x1d4] sm:$0xf0]  ;;  %v1808_v32 = vld [vmem:[#allocation8 + $0xd8] sm:$0xf0] }
  0x54   :  { %599 = vmatpush.bf16.msrb.mxu2 %v1475_v59  ;;  %v1878_v59 = vld [vmem:[#allocation8 + $0x160] sm:$0xf]  ;;  %v1935_v31 = vor.u32 %v2147_v29, %v1934_v28  ;;  %v2145_v39 = vld [vmem:[#allocation8 + $0x1c4] sm:$0xf0]  ;;  %v1800_v42 = vld [vmem:[#allocation8 + $0xc8] sm:$0xf0] }
  0x55   :  { %613 = vmatpush.bf16.msrb.mxu3 %v1603_v63  ;;  %v1879_v61 = vor.u32 %v2133_v60, %v1878_v59  ;;  %v1752_v63 = vld [vmem:[#allocation8 + $0x68] sm:$0xf0]  ;;  %v1926_v38 = vld [vmem:[#allocation8 + $0x1c0] sm:$0xf]  ;;  %v2125_v45 = vld [vmem:[#allocation8 + $0x124] sm:$0xf0] }
  0x56   :  { %572 = vmatpush.bf16.msrb.mxu0 %v1455_v6  ;;  %v1755_v1 = vor.u32 %v2100_v62, %v1752_v63  ;;  %v1951_v6 = vor.u32 %v2151_v4, %v1950_v3  ;;  %v1927_v41 = vor.u32 %v2145_v39, %v1926_v38  ;;  %v2092_v46 = vld [vmem:[#allocation8 + $0x24] sm:$0xf]  ;;  %v1720_v48 = vld [vmem:[#allocation8 + $0x28] sm:$0xf0]  ;;  %v2432_v49 = vld [vmem:[#allocation7] sm:$0xf] }
  0x57   :  { %586 = vmatpush.bf16.msrb.mxu1 %v1583_v9  ;;  %v1827_v9 = vor.u32 %v2118_v7, %v1824_v8  ;;  %v1723_v50 = vor.u32 %v2092_v46, %v1720_v48  ;;  %v2143_v53 = vld [vmem:[#allocation8 + $0x1b4] sm:$0xf0]  ;;  %v2110_v54 = vld [vmem:[#allocation8 + $0xb4] sm:$0xf]  ;;  %v1712_v63 = vld [vmem:[#allocation8 + $0x18] sm:$0xf0] }
  0x58   :  { %600 = vmatpush.bf16.msrb.mxu2 %v1459_v10  ;;  %v1870_v10 = vld [vmem:[#allocation8 + $0x150] sm:$0xf]  ;;  %v2123_v59 = vld [vmem:[#allocation8 + $0x114] sm:$0xf0]  ;;  %v2090_v62 = vld [vmem:[#allocation8 + $0x14] sm:$0xf] }
  0x59   :  { %614 = vmatpush.bf16.msrb.mxu3 %v1587_v11  ;;  %573 = vmatmul.bf16.vlgmr.msrb.gmra.mxu0 %v2420_v51  ;;  %v2131_v11 = vld [vmem:[#allocation8 + $0x154] sm:$0xf0]  ;;  %v1910_v0 = vld [vmem:[#allocation8 + $0x1a0] sm:$0xf]  ;;  %v2141_v2 = vld [vmem:[#allocation8 + $0x1a4] sm:$0xf0] }
  0x5a   :  { %1023 = vmatpush.bf16.msra.mxu0 %v1759_v12  ;;  %587 = vmatmul.bf16.vlgmr.msrb.gmra.mxu1 %v2422_v55  ;;  %v2098_v12 = vld [vmem:[#allocation8 + $0x54] sm:$0xf]  ;;  %v1871_v13 = vor.u32 %v2131_v11, %v1870_v10  ;;  %v2108_v3 = vld [vmem:[#allocation8 + $0xa4] sm:$0xf]  ;;  %v1784_v4 = vld [vmem:[#allocation8 + $0xa8] sm:$0xf0] }
  0x5b   :  { %1037 = vmatpush.bf16.msra.mxu1 %v1823_v15  ;;  %601 = vmatmul.bf16.vlgmr.msrb.gmra.mxu2 %v2420_v51  ;;  %v2111_v51 = vld [vmem:[#allocation8 + $0xb4] sm:$0xf0]  ;;  %v1747_v15 = vor.u32 %v2098_v12, %v1744_v14  ;;  %v171_v7 = vperm.slane %v2432_v49, 0  ;;  %v1830_v8 = vld [vmem:[#allocation8 + $0x100] sm:$0xf]  ;;  %s1421_s10 = sshll.u32 %s2515_s7, 4  ;;  %s1422_s10 = int_to_ptr.hbm [resolvable:$true] %s1421_s10 }
  0x5c   :  { %615 = vmatmul.bf16.vlgmr.msrb.gmra.mxu3 %v2422_v55  ;;  %v1718_v55 = vld [vmem:[#allocation8 + $0x20] sm:$0xf]  ;;  %v1791_v37 = vor.u32 %v2111_v51, %v1790_v34  ;;  %1051 = vmatpush.bf16.msra.mxu2 %v1887_v52  ;;  %v1854_v34 = vld [vmem:[#allocation8 + $0x130] sm:$0xf]  ;;  %v2127_v51 = vld [vmem:[#allocation8 + $0x134] sm:$0xf0] }
  0x5d   :  { %v1719_v40 = vor.u32 %v2093_v36, %v1718_v55  ;;  %1065 = vmatpush.bf16.msra.mxu3 %v1951_v6  ;;  %v1855_v55 = vor.u32 %v2127_v51, %v1854_v34  ;;  %v1728_v36 = vld [vmem:[#allocation8 + $0x38] sm:$0xf0]  ;;  %v1918_v52 = vld [vmem:[#allocation8 + $0x1b0] sm:$0xf]  ;;  %v1787_v6 = vor.u32 %v2108_v3, %v1784_v4  ;;  %v2088_v10 = vld [vmem:[#allocation8 + $0x4] sm:$0xf] }
  0x5e   :  { %1024 = vmatpush.bf16.msra.mxu0 %v1751_v18  ;;  %v2116_v18 = vld [vmem:[#allocation8 + $0xe4] sm:$0xf]  ;;  %v1919_v56 = vor.u32 %v2143_v53, %v1918_v52  ;;  %v1704_v12 = vld [vmem:[#allocation8 + $0x8] sm:$0xf0]  ;;  %v1888_v14 = vld [vmem:[#allocation8 + $0x178] sm:$0xf0] }
  0x5f   :  { %1038 = vmatpush.bf16.msra.mxu1 %v1815_v21  ;;  %v1819_v21 = vor.u32 %v2116_v18, %v1816_v20  ;;  %v1902_v17 = vld [vmem:[#allocation8 + $0x190] sm:$0xf]  ;;  %v2139_v18 = vld [vmem:[#allocation8 + $0x194] sm:$0xf0]  ;;  %v1776_v22 = vld [vmem:[#allocation8 + $0x98] sm:$0xf0] }
  0x60   :  { %1052 = vmatpush.bf16.msra.mxu2 %v1879_v61  ;;  %v1894_v29 = vld [vmem:[#allocation8 + $0x180] sm:$0xf]  ;;  %v2150_v34 = vld [vmem:[#allocation8 + $0x1f4] sm:$0xf]  ;;  %v1952_v51 = vld [vmem:[#allocation8 + $0x1f8] sm:$0xf0] }
  0x61   :  { %1066 = vmatpush.bf16.msra.mxu3 %v1943_v19  ;;  %v2106_v19 = vld [vmem:[#allocation8 + $0x94] sm:$0xf]  ;;  %v1872_v38 = vld [vmem:[#allocation8 + $0x158] sm:$0xf0]  ;;  %v2128_v52 = vld [vmem:[#allocation8 + $0x144] sm:$0xf] }
  0x62   :  { %1025 = vmatpush.bf16.msra.mxu0 %v1743_v24  ;;  %v2096_v24 = vld [vmem:[#allocation8 + $0x44] sm:$0xf]  ;;  %v1864_v53 = vld [vmem:[#allocation8 + $0x148] sm:$0xf0]  ;;  %s2363_s11 = smov 192   ;;  %s2364_s12 = smov 12  }
  0x63   :  { %1039 = vmatpush.bf16.msra.mxu1 %v1807_v27  ;;  %v1739_v27 = vor.u32 %v2096_v24, %v1736_v26  ;;  %v1779_v24 = vor.u32 %v2106_v19, %v1776_v22  ;;  %v1880_v26 = vld [vmem:[#allocation8 + $0x168] sm:$0xf0]  ;;  %v1840_v19 = vld [vmem:[#allocation8 + $0x118] sm:$0xf0] }
  0x64   :  { %1053 = vmatpush.bf16.msra.mxu2 %v1871_v13  ;;  %v2134_v13 = vld [vmem:[#allocation8 + $0x174] sm:$0xf] }
  0x65   :  { %1067 = vmatpush.bf16.msra.mxu3 %v1935_v31  ;;  %v1891_v16 = vor.u32 %v2134_v13, %v1888_v14  ;;  %v2104_v31 = vld [vmem:[#allocation8 + $0x84] sm:$0xf] }
  0x66   :  { %1026 = vmatpush.bf16.msra.mxu0 %v1735_v30  ;;  %v2114_v30 = vld [vmem:[#allocation8 + $0xd4] sm:$0xf] }
  0x67   :  { %1040 = vmatpush.bf16.msra.mxu1 %v1799_v33  ;;  %v1811_v33 = vor.u32 %v2114_v30, %v1808_v32  ;;  %v2137_v30 = vld [vmem:[#allocation8 + $0x184] sm:$0xf0] }
  0x68   :  { %1054 = vmatpush.bf16.msra.mxu2 %v1863_v25  ;;  %v2132_v25 = vld [vmem:[#allocation8 + $0x164] sm:$0xf]  ;;  %v1895_v32 = vor.u32 %v2137_v30, %v1894_v29 }
  0x69   :  { %1068 = vmatpush.bf16.msra.mxu3 %v1927_v41  ;;  %v1883_v28 = vor.u32 %v2132_v25, %v1880_v26  ;;  %v1832_v25 = vld [vmem:[#allocation8 + $0x108] sm:$0xf0] }
  0x6a   :  { %1027 = vmatpush.bf16.msra.mxu0 %v1727_v35  ;;  %v2094_v35 = vld [vmem:[#allocation8 + $0x34] sm:$0xf] }
  0x6b   :  { %1041 = vmatpush.bf16.msra.mxu1 %v1791_v37  ;;  %v1731_v37 = vor.u32 %v2094_v35, %v1728_v36  ;;  %v172_v36 = vperm.slane %v2432_v49, 1 }
  0x6c   :  { %1055 = vmatpush.bf16.msra.mxu2 %v1855_v55  ;;  %v1955_v55 = vor.u32 %v2150_v34, %v1952_v51  ;;  %v2136_v34 = vld [vmem:[#allocation8 + $0x184] sm:$0xf]  ;;  %v1896_v51 = vld [vmem:[#allocation8 + $0x188] sm:$0xf0] }
  0x6d   :  { %1069 = vmatpush.bf16.msra.mxu3 %v1919_v56 }
  0x6e   :  { %1028 = vmatpush.bf16.msra.mxu0 %v1719_v40  ;;  %v2112_v40 = vld [vmem:[#allocation8 + $0xc4] sm:$0xf] }
  0x6f   :  { %1042 = vmatpush.bf16.msra.mxu1 %v1783_v43  ;;  %v1803_v43 = vor.u32 %v2112_v40, %v1800_v42 }
  0x72   :  { %1029 = vmatpush.bf16.msra.mxu0 %v1711_v44  ;;  %v1846_v44 = vld [vmem:[#allocation8 + $0x120] sm:$0xf] }
  0x73   :  { %1043 = vmatpush.bf16.msra.mxu1 %v1775_v58  ;;  %v1838_v58 = vld [vmem:[#allocation8 + $0x110] sm:$0xf] }
  0x74   :  { %v1839_v61 = vor.u32 %v2123_v59, %v1838_v58  ;;  %v2146_v58 = vld [vmem:[#allocation8 + $0x1d4] sm:$0xf]  ;;  %v1936_v59 = vld [vmem:[#allocation8 + $0x1d8] sm:$0xf0] }
  0x76   :  { %1030 = vmatpush.bf16.msra.mxu0 %v1703_v47  ;;  %v1847_v47 = vor.u32 %v2125_v45, %v1846_v44  ;;  %v2148_v44 = vld [vmem:[#allocation8 + $0x1e4] sm:$0xf]  ;;  %v1944_v45 = vld [vmem:[#allocation8 + $0x1e8] sm:$0xf0] }
  0x77   :  { %1044 = vmatpush.bf16.msra.mxu1 %v1767_v5  ;;  %v1911_v5 = vor.u32 %v2141_v2, %v1910_v0  ;;  %v1947_v48 = vor.u32 %v2148_v44, %v1944_v45  ;;  %v1856_v0 = vld [vmem:[#allocation8 + $0x138] sm:$0xf0] }
  0x78   :  { %1056 = vmatpush.bf16.msra.mxu2 %v1847_v47 }
  0x79   :  { %1070 = vmatpush.bf16.msra.mxu3 %v1911_v5 }
  0x7a   :  { %1079 = vmatpush.bf16.msrb.mxu0 %v1763_v57  ;;  %v1792_v57 = vld [vmem:[#allocation8 + $0xb8] sm:$0xf0] }
  0x7b   :  { %1093 = vmatpush.bf16.msrb.mxu1 %v1827_v9  ;;  %v1795_v60 = vor.u32 %v2110_v54, %v1792_v57  ;;  %v2121_v9 = vld [vmem:[#allocation8 + $0x104] sm:$0xf0]  ;;  %v1867_v57 = vor.u32 %v2128_v52, %v1864_v53 }
  0x7c   :  { %1057 = vmatpush.bf16.msra.mxu2 %v1839_v61  ;;  %v1831_v11 = vor.u32 %v2121_v9, %v1830_v8  ;;  %v1939_v61 = vor.u32 %v2146_v58, %v1936_v59  ;;  %v2159_v58 = vld [vmem:[#allocation10 + $0x38] sm:$0xff] }
  0x7d   :  { %v2167_v59 = vld [vmem:[#allocation10 + $0x78] sm:$0xff] }
  0x7e   :  { %1080 = vmatpush.bf16.msrb.mxu0 %v1755_v1  ;;  %v1715_v1 = vor.u32 %v2090_v62, %v1712_v63  ;;  %v2126_v63 = vld [vmem:[#allocation8 + $0x134] sm:$0xf] }
  0x7f   :  { %1094 = vmatpush.bf16.msrb.mxu1 %v1819_v21  ;;  %v1903_v21 = vor.u32 %v2139_v18, %v1902_v17  ;;  %v1859_v3 = vor.u32 %v2126_v63, %v1856_v0  ;;  %v2122_v18 = vld [vmem:[#allocation8 + $0x114] sm:$0xf]  ;;  %v2165_v63 = vld [vmem:[#allocation10 + $0x68] sm:$0xff]  ;;  %v2156_v0 = vld [vmem:[#allocation10 + $0x20] sm:$0xff] }
  0x80   :  { %1058 = vmatpush.bf16.msra.mxu2 %v1831_v11  ;;  %v2124_v11 = vld [vmem:[#allocation8 + $0x124] sm:$0xf]  ;;  %v1843_v22 = vor.u32 %v2122_v18, %v1840_v19 }
  0x81   :  { %1071 = vmatpush.bf16.msra.mxu3 %v1903_v21 }
  0x82   :  { %1081 = vmatpush.bf16.msrb.mxu0 %v1747_v15  ;;  %v1707_v15 = vor.u32 %v2088_v10, %v1704_v12  ;;  %v1848_v12 = vld [vmem:[#allocation8 + $0x128] sm:$0xf0] }
  0x83   :  { %1095 = vmatpush.bf16.msrb.mxu1 %v1811_v33  ;;  %v1768_v33 = vld [vmem:[#allocation8 + $0x88] sm:$0xf0]  ;;  %v1851_v13 = vor.u32 %v2124_v11, %v1848_v12 }
  0x84   :  { %1107 = vmatpush.bf16.msrb.mxu2 %v1891_v16  ;;  %v1771_v35 = vor.u32 %v2104_v31, %v1768_v33  ;;  %v1920_v16 = vld [vmem:[#allocation8 + $0x1b8] sm:$0xf0] }
  0x85   :  { %1072 = vmatpush.bf16.msra.mxu3 %v1895_v32  ;;  %v173_v32 = vperm.slane %v2432_v49, 2 }
  0x86   :  { %1082 = vmatpush.bf16.msrb.mxu0 %v1739_v27 }
  0x87   :  { %1096 = vmatpush.bf16.msrb.mxu1 %v1803_v43 }
  0x88   :  { %1108 = vmatpush.bf16.msrb.mxu2 %v1883_v28  ;;  %v1904_v28 = vld [vmem:[#allocation8 + $0x198] sm:$0xf0] }
  0x89   :  { %1121 = vmatpush.bf16.msrb.mxu3 %v1955_v55 }
  0x8a   :  { %1083 = vmatpush.bf16.msrb.mxu0 %v1731_v37  ;;  %v2130_v37 = vld [vmem:[#allocation8 + $0x154] sm:$0xf] }
  0x8b   :  { %1097 = vmatpush.bf16.msrb.mxu1 %v1795_v60  ;;  %v1875_v41 = vor.u32 %v2130_v37, %v1872_v38  ;;  %v174_v37 = vperm.slane %v2432_v49, 3 }
  0x8d   :  { %1109 = vmatpush.bf16.msrb.mxu2 %v1875_v41  ;;  %1122 = vmatpush.bf16.msrb.mxu3 %v1947_v48 }
  0x8e   :  { %1084 = vmatpush.bf16.msrb.mxu0 %v1723_v50 }
  0x8f   :  { %1098 = vmatpush.bf16.msrb.mxu1 %v1787_v6  ;;  %v2144_v6 = vld [vmem:[#allocation8 + $0x1c4] sm:$0xf] }
  0x91   :  { %1110 = vmatpush.bf16.msrb.mxu2 %v1867_v57  ;;  %1123 = vmatpush.bf16.msrb.mxu3 %v1939_v61  ;;  %v2166_v61 = vld [vmem:[#allocation10 + $0x70] sm:$0xff] }
  0x92   :  { %1085 = vmatpush.bf16.msrb.mxu0 %v1715_v1 }
  0x93   :  { %1099 = vmatpush.bf16.msrb.mxu1 %v1779_v24  ;;  %v2120_v24 = vld [vmem:[#allocation8 + $0x104] sm:$0xf] }
  0x94   :  { %v1835_v29 = vor.u32 %v2120_v24, %v1832_v25 }
  0x95   :  { %1111 = vmatpush.bf16.msrb.mxu2 %v1859_v3  ;;  %v2155_v3 = vld [vmem:[#allocation10 + $0x18] sm:$0xff] }
  0x96   :  { %1086 = vmatpush.bf16.msrb.mxu0 %v1707_v15  ;;  %v2142_v15 = vld [vmem:[#allocation8 + $0x1b4] sm:$0xf] }
  0x97   :  { %1100 = vmatpush.bf16.msrb.mxu1 %v1771_v35  ;;  %v1923_v17 = vor.u32 %v2142_v15, %v1920_v16  ;;  %v1899_v35 = vor.u32 %v2136_v34, %v1896_v51  ;;  %v697_v15 = vld [vmem:[%s2512_s4] sm:$0x3] }
  0x98   :  { %v699_v18 = vperm.slane %v697_v15, 0 }
  0x99   :  { %1112 = vmatpush.bf16.msrb.mxu2 %v1851_v13  ;;  %v2152_v13 = vld [vmem:[#allocation10] sm:$0xff] }
  0x9d   :  { %1113 = vmatpush.bf16.msrb.mxu2 %v1843_v22 }
  0xa1   :  { %1114 = vmatpush.bf16.msrb.mxu2 %v1835_v29 }
  0xb6   :  { %v518_v20 = vpop.f32.mrf.mxu0 }
  0xb7   :  { %v532_v23 = vpop.f32.mrf.mxu1  ;;  %v519_v27 = vadd.f32 %v518_v20, %v171_v7  ;;  %v2140_v20 = vld [vmem:[#allocation8 + $0x1a4] sm:$0xf] }
  0xb9   :  { %v533_v39 = vadd.f32 %v532_v23, %v519_v27  ;;  %v1912_v23 = vld [vmem:[#allocation8 + $0x1a8] sm:$0xf0]  ;;  %v2138_v27 = vld [vmem:[#allocation8 + $0x194] sm:$0xf] }
  0xba   :  { %v1915_v26 = vor.u32 %v2140_v20, %v1912_v23  ;;  %v1907_v30 = vor.u32 %v2138_v27, %v1904_v28 }
  0xbb   :  { %v621_v54 = vmax.f32 %v533_v39, 0.0 }
  0xbe   :  { %v546_v40 = vpop.f32.mrf.mxu2  ;;  %v520_v42 = vpop.f32.mrf.mxu0 }
  0xbf   :  { %v560_v43 = vpop.f32.mrf.mxu3  ;;  %v521_v46 = vadd.f32 %v520_v42, %v171_v7  ;;  %v534_v47 = vpop.f32.mrf.mxu1  ;;  %v547_v50 = vadd.f32 %v546_v40, %v172_v36  ;;  %v1928_v7 = vld [vmem:[#allocation8 + $0x1c8] sm:$0xf0] }
  0xc0   :  { %v1931_v8 = vor.u32 %v2144_v6, %v1928_v7  ;;  %v2154_v6 = vld [vmem:[#allocation10 + $0x10] sm:$0xff] }
  0xc1   :  { %v535_v56 = vadd.f32 %v534_v47, %v521_v46  ;;  %v561_v62 = vadd.f32 %v560_v43, %v547_v50  ;;  %v2162_v7 = vld [vmem:[#allocation10 + $0x50] sm:$0xff] }
  0xc2   :  { %1124 = vmatpush.bf16.msrb.mxu3 %v1931_v8 }
  0xc3   :  { %v625_v60 = vmax.f32 %v535_v56, 0.0  ;;  %v622_v9 = vmax.f32 %v561_v62, 0.0  ;;  %v2157_v62 = vld [vmem:[#allocation10 + $0x28] sm:$0xff] }
  0xc5   :  { %v629_v1 = vpack.c.bf16 %v625_v60, %v621_v54  ;;  %v2158_v60 = vld [vmem:[#allocation10 + $0x30] sm:$0xff] }
  0xc6   :  { %v548_v2 = vpop.f32.mrf.mxu2  ;;  %1125 = vmatpush.bf16.msrb.mxu3 %v1923_v17 }
  0xc7   :  { %v549_v4 = vadd.f32 %v548_v2, %v172_v36  ;;  %v562_v5 = vpop.f32.mrf.mxu3  ;;  %1031 = vmatmul.bf16.vlgmr.msra.gmra.mxu0 %v629_v1 }
  0xc8   :  { %1285 = vmatpush.bf16.msra.mxu0 %v2159_v58 }
  0xc9   :  { %v563_v10 = vadd.f32 %v562_v5, %v549_v4  ;;  %v2163_v4 = vld [vmem:[#allocation10 + $0x58] sm:$0xff] }
  0xca   :  { %1126 = vmatpush.bf16.msrb.mxu3 %v1915_v26 }
  0xcb   :  { %v626_v14 = vmax.f32 %v563_v10, 0.0  ;;  %v2161_v10 = vld [vmem:[#allocation10 + $0x48] sm:$0xff] }
  0xcc   :  { %1286 = vmatpush.bf16.msra.mxu0 %v2158_v60 }
  0xcd   :  { %v630_v21 = vpack.c.bf16 %v626_v14, %v622_v9  ;;  %v2153_v9 = vld [vmem:[#allocation10 + $0x8] sm:$0xff]  ;;  %v2160_v14 = vld [vmem:[#allocation10 + $0x40] sm:$0xff] }
  0xce   :  { %1127 = vmatpush.bf16.msrb.mxu3 %v1907_v30 }
  0xcf   :  { %1045 = vmatmul.bf16.vlgmr.msra.gmra.mxu1 %v630_v21 }
  0xd0   :  { %1299 = vmatpush.bf16.msra.mxu1 %v2167_v59  ;;  %1287 = vmatpush.bf16.msra.mxu0 %v2157_v62  ;;  %v2182_v59 = vld [vmem:[%s2514_s6] ss:$0 sm:$0xff]  ;;  %s2362_s6 = smov [#allocation11]  }
  0xd1   :  { %s1419_s30 = sshll.u32 %s2362_s6, 4  ;;  %s1420_s30 = int_to_ptr.vmem [resolvable:$true] %s1419_s30 }
  0xd2   :  { %1128 = vmatpush.bf16.msrb.mxu3 %v1899_v35 }
  0xd4   :  { %1300 = vmatpush.bf16.msra.mxu1 %v2166_v61  ;;  %1288 = vmatpush.bf16.msra.mxu0 %v2156_v0 }
  0xd6   :  { %v574_v31 = vpop.f32.mrf.mxu0 }
  0xd7   :  { %v588_v33 = vpop.f32.mrf.mxu1  ;;  %1087 = vmatmul.bf16.vlgmr.msrb.gmra.mxu0 %v629_v1  ;;  %v575_v55 = vadd.f32 %v574_v31, %v173_v32  ;;  %v2164_v1 = vld [vmem:[#allocation10 + $0x60] sm:$0xff] }
  0xd8   :  { %1301 = vmatpush.bf16.msra.mxu1 %v2165_v63  ;;  %1289 = vmatpush.bf16.msra.mxu0 %v2155_v3 }
  0xd9   :  { %v589_v40 = vadd.f32 %v588_v33, %v575_v55 }
  0xdb   :  { %v623_v45 = vmax.f32 %v589_v40, 0.0 }
  0xdc   :  { %1302 = vmatpush.bf16.msra.mxu1 %v2164_v1  ;;  %1290 = vmatpush.bf16.msra.mxu0 %v2154_v6 }
  0xde   :  { %v602_v36 = vpop.f32.mrf.mxu2  ;;  %v576_v39 = vpop.f32.mrf.mxu0 }
  0xdf   :  { %v616_v38 = vpop.f32.mrf.mxu3  ;;  %v577_v41 = vadd.f32 %v576_v39, %v173_v32  ;;  %v590_v42 = vpop.f32.mrf.mxu1  ;;  %1101 = vmatmul.bf16.vlgmr.msrb.gmra.mxu1 %v630_v21  ;;  %v603_v44 = vadd.f32 %v602_v36, %v174_v37  ;;  %v700_v21 = vperm.slane %v697_v15, 1 }
  0xe0   :  { %1303 = vmatpush.bf16.msra.mxu1 %v2163_v4  ;;  %1291 = vmatpush.bf16.msra.mxu0 %v2153_v9 }
  0xe1   :  { %v591_v43 = vadd.f32 %v590_v42, %v577_v41  ;;  %v617_v50 = vadd.f32 %v616_v38, %v603_v44 }
  0xe3   :  { %v627_v46 = vmax.f32 %v591_v43, 0.0  ;;  %v624_v56 = vmax.f32 %v617_v50, 0.0 }
  0xe4   :  { %1304 = vmatpush.bf16.msra.mxu1 %v2162_v7  ;;  %1292 = vmatpush.bf16.msra.mxu0 %v2152_v13 }
  0xe5   :  { %v631_v47 = vpack.c.bf16 %v627_v46, %v623_v45 }
  0xe6   :  { %v604_v48 = vpop.f32.mrf.mxu2 }
  0xe7   :  { %v605_v52 = vadd.f32 %v604_v48, %v174_v37  ;;  %v618_v53 = vpop.f32.mrf.mxu3  ;;  %1059 = vmatmul.bf16.vlgmr.msra.gmra.mxu2 %v631_v47 }
  0xe8   :  { %1305 = vmatpush.bf16.msra.mxu1 %v2161_v10 }
  0xe9   :  { %v619_v54 = vadd.f32 %v618_v53, %v605_v52 }
  0xeb   :  { %v628_v57 = vmax.f32 %v619_v54, 0.0 }
  0xec   :  { %1306 = vmatpush.bf16.msra.mxu1 %v2160_v14 }
  0xed   :  { %v632_v49 = vpack.c.bf16 %v628_v57, %v624_v56 }
  0xef   :  { %1073 = vmatmul.bf16.vlgmr.msra.gmra.mxu3 %v632_v49 }
  0xf7   :  { %1115 = vmatmul.bf16.vlgmr.msrb.gmra.mxu2 %v631_v47 }
  0xff   :  { %1129 = vmatmul.bf16.vlgmr.msrb.gmra.mxu3 %v632_v49  ;;  %v1313_v49 = vlaneseq }
 0x101   :  { %v2441_v58 = vand.u32 127, %v1313_v49 }
 0x103   :  { %vm1353_vm0 = vcmp.ge.s32.totalorder %v2441_v58, 12  ;;  %vm1354_vm1 = vcmp.lt.s32.totalorder %v2441_v58, 15  ;;  %vm1406_vm11 = vcmp.lt.s32.totalorder %v2441_v58, 2 }
 0x104   :  { %vm2448_vm2 = vmand %vm1353_vm0, %vm1354_vm1 }
 0x144   :  { %v1032_v2 = vpop.f32.mrf.mxu0 }
 0x145   :  { %v1033_v20 = vadd.f32 %v1032_v2, %v699_v18 }
 0x14c   :  { %v1046_v5 = vpop.f32.mrf.mxu1  ;;  %v1034_v11 = vpop.f32.mrf.mxu0 }
 0x14d   :  { %v1047_v25 = vadd.f32 %v1046_v5, %v1033_v20  ;;  %v1035_v33 = vadd.f32 %v1034_v11, %v699_v18 }
 0x154   :  { %v1048_v12 = vpop.f32.mrf.mxu1  ;;  %v1088_v19 = vpop.f32.mrf.mxu0 }
 0x155   :  { %v1089_v26 = vadd.f32 %v1088_v19, %v700_v21  ;;  %v1049_v35 = vadd.f32 %v1048_v12, %v1035_v33 }
 0x15c   :  { %v1102_v22 = vpop.f32.mrf.mxu1  ;;  %v1090_v31 = vpop.f32.mrf.mxu0 }
 0x15d   :  { %v1103_v27 = vadd.f32 %v1102_v22, %v1089_v26  ;;  %v1091_v55 = vadd.f32 %v1090_v31, %v700_v21 }
 0x164   :  { %v1104_v51 = vpop.f32.mrf.mxu1 }
 0x165   :  { %v1105_v39 = vadd.f32 %v1104_v51, %v1091_v55 }
 0x16a   :  { %v1060_v8 = vpop.f32.mrf.mxu2 }
 0x16b   :  { %v1061_v28 = vadd.f32 %v1060_v8, %v1047_v25 }
 0x172   :  { %v1074_v16 = vpop.f32.mrf.mxu3  ;;  %v1062_v17 = vpop.f32.mrf.mxu2 }
 0x173   :  { %v1075_v29 = vadd.f32 %v1074_v16, %v1061_v28  ;;  %v1063_v40 = vadd.f32 %v1062_v17, %v1049_v35 }
 0x175   :  { %v1135_v36 = vmax.f32 %v1075_v29, 0.0 }
 0x17a   :  { %v1076_v23 = vpop.f32.mrf.mxu3  ;;  %v1116_v24 = vpop.f32.mrf.mxu2 }
 0x17b   :  { %v1117_v30 = vadd.f32 %v1116_v24, %v1103_v27  ;;  %v1077_v42 = vadd.f32 %v1076_v23, %v1063_v40 }
 0x17d   :  { %v1137_v46 = vmax.f32 %v1077_v42, 0.0 }
 0x182   :  { %v1130_v32 = vpop.f32.mrf.mxu3  ;;  %v1118_v38 = vpop.f32.mrf.mxu2 }
 0x183   :  { %v1131_v34 = vadd.f32 %v1130_v32, %v1117_v30  ;;  %v1119_v43 = vadd.f32 %v1118_v38, %v1105_v39 }
 0x185   :  { %v1136_v37 = vmax.f32 %v1131_v34, 0.0 }
 0x187   :  { %v1139_v41 = vpack.c.bf16 %v1136_v37, %v1135_v36 }
 0x189   :  { %1141 = vst [vmem:[#allocation11] sm:$0xff] %v1139_v41  ;;  %v1181_v50 = vunpack.c.l.b16 %v1139_v41  ;;  %v1182_v52 = vunpack.c.h.b16 %v1139_v41 }
 0x18a   :  { %v1132_v44 = vpop.f32.mrf.mxu3 }
 0x18b   :  { %v1133_v45 = vadd.f32 %v1132_v44, %v1119_v43 }
 0x18d   :  { %v1138_v47 = vmax.f32 %v1133_v45, 0.0 }
 0x18f   :  { %v1140_v48 = vpack.c.bf16 %v1138_v47, %v1137_v46 }
 0x191   :  { %1142 = vst [vmem:[#allocation11 + $0xc] sm:$0xff] %v1140_v48  ;;  %v1183_v53 = vunpack.c.l.b16 %v1140_v48  ;;  %v1184_v54 = vunpack.c.h.b16 %v1140_v48 }
 0x193   :  { %v1185_v56 = vpack.c.b16 %v1183_v53, %v1181_v50  ;;  %v1186_v57 = vpack.c.b16 %v1184_v54, %v1182_v52 }
 0x195   :  { %1293 = vmatmul.bf16.vlgmr.msra.gmra.mxu0 %v1185_v56  ;;  %1307 = vmatmul.bf16.vlgmr.msra.gmra.mxu1 %v1186_v57 }
 0x212   :  { %v1294_v60 = vpop.f32.mrf.mxu0  ;;  %v1308_v61 = vpop.f32.mrf.mxu1 }
 0x213   :  { %v1295_v62 = vadd.f32 %v2182_v59, %v1294_v60 }
 0x215   :  { %v2452_v0 = vadd.f32 %v1308_v61, %v1295_v62 }
 0x217   :  { %v1356_v1 = vsel %vm2448_vm2, %v2452_v0, -inf  ;;  %v2020_v19 = vmul.f32 -1.442695, %v2452_v0 }
 0x218   :  { %1358 = vmax.xlane.f32.xlu0 %v1356_v1 }
 0x21a   :  { %v1296_v2 = vpop.f32.mrf.mxu0  ;;  %v1310_v4 = vpop.f32.mrf.mxu1 }
 0x21b   :  { %v1297_v3 = vadd.f32 %v2182_v59, %v1296_v2 }
 0x21d   :  { %v2457_v5 = vadd.f32 %v1310_v4, %v1297_v3 }
 0x21f   :  { %v1357_v6 = vsel %vm2448_vm2, %v2457_v5, -inf  ;;  %v2021_v20 = vmul.f32 -1.442695, %v2457_v5 }
 0x220   :  { %1360 = vmax.xlane.f32.xlu0 %v1357_v6 }
 0x28b   :  { %v1359_v7 = vpop.xlane.xlu0 %1358 }
 0x28c   :  { %v1362_v8 = vsub.f32 %v2452_v0, %v1359_v7 }
 0x28e   :  { %v1364_v9 = vmin.f32 %v1362_v8, 0.0 }
 0x290   :  { %v1366_v10 = vmul.f32 1.442695, %v1364_v9 }
 0x292   :  { %2183 = vpow2.f32 %v1366_v10 }
 0x293   :  { %v1361_v11 = vpop.xlane.xlu0 %1360 }
 0x294   :  { %v1363_v12 = vsub.f32 %v2457_v5, %v1361_v11 }
 0x296   :  { %v1365_v13 = vmin.f32 %v1363_v12, 0.0 }
 0x298   :  { %v2184_v14 = vpop.eup %2183  ;;  %v1368_v15 = vmul.f32 1.442695, %v1365_v13 }
 0x299   :  { %v1370_v16 = vsel %vm2448_vm2, %v2184_v14, 0.0 }
 0x29a   :  { %2185 = vpow2.f32 %v1368_v15  ;;  %1372 = vadd.xlane.f32.xlu1 %v1370_v16 }
 0x29b   :  { %2187 = vpow2.f32 %v2020_v19 }
 0x29c   :  { %2189 = vpow2.f32 %v2021_v20 }
 0x2a0   :  { %v2186_v17 = vpop.eup %2185 }
 0x2a1   :  { %v2468_v18 = vsel %vm2448_vm2, %v2186_v17, 0.0  ;;  %v2188_v21 = vpop.eup %2187 }
 0x2a2   :  { %1374 = vadd.xlane.f32.xlu1 %v2468_v18  ;;  %v1321_v22 = vadd.f32 1.0, %v2188_v21  ;;  %v2190_v23 = vpop.eup %2189 }
 0x2a3   :  { %v2473_v24 = vadd.f32 1.0, %v2190_v23 }
 0x2a4   :  { %2191 = vrcp.f32 %v1321_v22  ;;  %vm1328_vm5 = vweird.f32 %v1321_v22  ;;  %v1334_v38 = vand.u32 2147483648, %v1321_v22  ;;  %v1332_v41 = vand.u32 2147483647, %v1321_v22 }
 0x2a5   :  { %2193 = vrcp.f32 %v2473_v24  ;;  %v1349_v1 = vand.u32 2147483648, %v2473_v24  ;;  %vm1343_vm15 = vweird.f32 %v2473_v24  ;;  %v1347_v4 = vand.u32 2147483647, %v2473_v24 }
 0x2a6   :  { %v1335_v48 = vor.u32 1.1754944e-38, %v1334_v38  ;;  %vm1333_vm10 = vcmp.eq.f32.partialorder %v1332_v41, 8.507059e+37 }
 0x2a7   :  { %v1350_v9 = vor.u32 1.1754944e-38, %v1349_v1 }
 0x2aa   :  { %v2192_v25 = vpop.eup %2191 }
 0x2ab   :  { %v1324_v26 = vmul.f32 %v2192_v25, %v1321_v22  ;;  %v2476_v29 = vpop.eup %2193  ;;  %vm1329_vm3 = vweird.f32 %v2192_v25 }
 0x2ac   :  { %v1339_v34 = vmul.f32 %v2476_v29, %v2473_v24  ;;  %vm2480_vm6 = vmor %vm1328_vm5, %vm1329_vm3  ;;  %vm1344_vm13 = vweird.f32 %v2476_v29 }
 0x2ad   :  { %v1325_v28 = vsub.f32 1.0, %v1324_v26  ;;  %vm1345_vm1 = vmor %vm1343_vm15, %vm1344_vm13 }
 0x2ae   :  { %v1340_v39 = vsub.f32 1.0, %v1339_v34 }
 0x2af   :  { %v1326_v31 = vmul.f32 %v2192_v25, %v1325_v28 }
 0x2b0   :  { %v1341_v50 = vmul.f32 %v2476_v29, %v1340_v39 }
 0x2b1   :  { %v1327_v55 = vadd.f32 %v2192_v25, %v1326_v31 }
 0x2b2   :  { %v1342_v61 = vadd.f32 %v2476_v29, %v1341_v50 }
 0x2b3   :  { %v1331_v46 = vsel %vm2480_vm6, %v2192_v25, %v1327_v55 }
 0x2b4   :  { %v1336_v56 = vsel %vm1333_vm10, %v1335_v48, %v1331_v46  ;;  %v1346_v7 = vsel %vm1345_vm1, %v2476_v29, %v1342_v61 }
 0x30d   :  { %v1373_v27 = vpop.xlane.xlu1 %1372 }
 0x30e   :  { %2195 = vrcp.f32 %v1373_v27  ;;  %v1387_v35 = vand.u32 2147483648, %v1373_v27  ;;  %v1385_v37 = vand.u32 2147483647, %v1373_v27  ;;  %vm1381_vm7 = vweird.f32 %v1373_v27 }
 0x310   :  { %v1388_v44 = vor.u32 1.1754944e-38, %v1387_v35  ;;  %vm1386_vm9 = vcmp.eq.f32.partialorder %v1385_v37, 8.507059e+37 }
 0x314   :  { %v2196_v30 = vpop.eup %2195 }
 0x315   :  { %v1377_v32 = vmul.f32 %v2196_v30, %v1373_v27  ;;  %v1375_v33 = vpop.xlane.xlu1 %1374  ;;  %vm1382_vm4 = vweird.f32 %v2196_v30 }
 0x316   :  { %2197 = vrcp.f32 %v1375_v33  ;;  %vm1383_vm8 = vmor %vm1381_vm7, %vm1382_vm4  ;;  %v1402_v57 = vand.u32 2147483648, %v1375_v33  ;;  %v1400_v60 = vand.u32 2147483647, %v1375_v33  ;;  %vm1396_vm14 = vweird.f32 %v1375_v33 }
 0x317   :  { %v1378_v51 = vsub.f32 1.0, %v1377_v32  ;;  %vm1348_vm4 = vcmp.eq.f32.partialorder %v1347_v4, 8.507059e+37 }
 0x318   :  { %vm1401_vm3 = vcmp.eq.f32.partialorder %v1400_v60, 8.507059e+37  ;;  %v1351_v11 = vsel %vm1348_vm4, %v1350_v9, %v1346_v7 }
 0x319   :  { %v1379_v36 = vmul.f32 %v2196_v30, %v1378_v51 }
 0x31b   :  { %v1380_v42 = vadd.f32 %v2196_v30, %v1379_v36 }
 0x31c   :  { %v2198_v43 = vpop.eup %2197 }
 0x31d   :  { %v1384_v45 = vsel %vm1383_vm8, %v2196_v30, %v1380_v42  ;;  %v1392_v47 = vmul.f32 %v2198_v43, %v1375_v33  ;;  %vm1397_vm12 = vweird.f32 %v2198_v43 }
 0x31e   :  { %v1389_v52 = vsel %vm1386_vm9, %v1388_v44, %v1384_v45  ;;  %vm1398_vm0 = vmor %vm1396_vm14, %vm1397_vm12 }
 0x31f   :  { %v1390_v53 = vmul.f32 %v1389_v52, %v1370_v16  ;;  %v1393_v54 = vsub.f32 1.0, %v1392_v47 }
 0x321   :  { %v1407_v49 = vsel %vm2448_vm2, %v1390_v53, %v2452_v0  ;;  %v1394_v59 = vmul.f32 %v2198_v43, %v1393_v54  ;;  %v1403_v0 = vor.u32 1.1754944e-38, %v1402_v57 }
 0x322   :  { %v1409_v62 = vsel %vm1406_vm11, %v1336_v56, %v1407_v49 }
 0x323   :  { %v1395_v2 = vadd.f32 %v2198_v43, %v1394_v59  ;;  %v1411_v3 = vpack.c.bf16 %v1409_v62, %v1409_v62 }
 0x325   :  { %v1399_v6 = vsel %vm1398_vm0, %v2198_v43, %v1395_v2  ;;  %1413 = vst [vmem:[#allocation11 + $0x8] sm:$0xf] %v1411_v3 }
 0x326   :  { %v1404_v8 = vsel %vm1401_vm3, %v1403_v0, %v1399_v6 }
 0x327   :  { %v1405_v10 = vmul.f32 %v1404_v8, %v2468_v18 }
 0x329   :  { %v1408_v12 = vsel %vm2448_vm2, %v1405_v10, %v2457_v5 }
 0x32a   :  { %v1410_v13 = vsel %vm1406_vm11, %v1351_v11, %v1408_v12 }
 0x32b   :  { %v1412_v14 = vpack.c.bf16 %v1410_v13, %v1410_v13 }
 0x32d   :  { %1414 = vst [vmem:[#allocation11 + $0x14] sm:$0xf] %v1412_v14 }
 0x32e   :  { %1427 = dma.vmem_to_hbm [thread:$0]  %s1420_s30, 384, %s1422_s10, [#allocation4], %s2363_s11, %s2363_s11, %s2364_s12  }
 0x32f   :  { %2349 = dma.done.wait [#allocation4], 384  }
 0x330   :  { %2350 = vsyncadd [#allocation4], 4294966912 }
 0x331   :  { %1432 = vsyncpa [#allocation3], 1 }
 0x332   :  { %1433 = vsyncpa [#allocation6], 1 }
 0x333   :  { %1434 = vsyncpa [#allocation9], 1 }
 0x334   :  { %1435 = vsyncpa [#allocation4], 1 }

</bundles_post_ra>
